<compile_context>
chip_gen: v7x
topology: tpu7x:2x2x1
jax: 0.10.0
libtpu: 0.0.40
codegen_flags: <defaults>
</compile_context>

<pallas_src>
import jax
import jax.numpy as jnp
from jax.experimental import pallas as pl
from jax.experimental.pallas import tpu as pltpu

IN_FEATURES = 3 * 32 * 32   # 3072
HIDDEN = 120
HIDDEN_PAD = 128            # lane-aligned hidden width (extra units are exact zeros)
OUT_FEATURES = 10

DEFAULT_BLOCK_B = 1024      # 1024 x 3072 f32 = 12 MiB/buffer; fits v5e/v6e/v7x


def _round_up(n, m):
    return ((n + m - 1) // m) * m


def _mlp_kernel(x_ref, w1_ref, b1_ref, w2_ref, b2_ref, o_ref):
    # One batch tile per grid step; weights are VMEM-resident across steps.
    x = x_ref[...]                                        # (TB, 3072)
    h = jnp.dot(x, w1_ref[...],
                preferred_element_type=jnp.float32)       # (TB, 128) -> MXU, f32 acc
    h = jnp.tanh(h + b1_ref[...])                         # bias + EUP tanh in f32
    y = jnp.dot(h, w2_ref[...],
                preferred_element_type=jnp.float32)       # (TB, 10)
    o_ref[...] = (y + b2_ref[...]).astype(o_ref.dtype)


def two_layer(x, w1, b1, w2, b2, *, block_b=DEFAULT_BLOCK_B):
    """Forward pass of TwoLayer.

    x  : (B, 3, 32, 32), f32 or bf16 (pass bf16 from the producer to halve the
         x HBM stream; accumulation stays f32 either way)
    w1 : (3072, 120)  b1: (120,)
    w2 : (120, 10)    b2: (10,)
    returns (B, 10) float32
    """
    B = x.shape[0]
    x_flat = x.reshape(B, IN_FEATURES)                    # row-major flatten, free

    # Zero-pad hidden 120 -> 128 (lane-aligned). Numerically exact: padded units
    # have zero weights/bias, tanh(0)=0, and zero rows in w2 contribute nothing.
    w1_p = jnp.pad(w1, ((0, 0), (0, HIDDEN_PAD - HIDDEN))).astype(x_flat.dtype)
    b1_p = (jnp.pad(b1, (0, HIDDEN_PAD - HIDDEN))
            .reshape(1, HIDDEN_PAD).astype(jnp.float32))
    w2_p = jnp.pad(w2, ((0, HIDDEN_PAD - HIDDEN), (0, 0))).astype(jnp.float32)
    b2_2d = b2.reshape(1, OUT_FEATURES).astype(jnp.float32)

    # Batch tile: multiple of the sublane pack (8 rows f32, 16 rows bf16),
    # capped at block_b and at the (rounded-up) batch.
    itemsize = jnp.dtype(x_flat.dtype).itemsize
    sub = 32 // itemsize                                  # 8 for f32, 16 for bf16
    tb = min(block_b, _round_up(B, sub))
    tb = max(sub, (tb // sub) * sub)
    grid = (pl.cdiv(B, tb),)                              # ragged last block is masked

    cost = pl.CostEstimate(
        flops=2 * B * IN_FEATURES * HIDDEN_PAD + 2 * B * HIDDEN_PAD * OUT_FEATURES,
        transcendentals=B * HIDDEN_PAD,
        bytes_accessed=(B * IN_FEATURES * itemsize
                        + IN_FEATURES * HIDDEN_PAD * itemsize
                        + HIDDEN_PAD * OUT_FEATURES * 4
                        + B * OUT_FEATURES * 4),
    )

    out = pl.pallas_call(
        _mlp_kernel,
        out_shape=jax.ShapeDtypeStruct((B, OUT_FEATURES), jnp.float32),
        grid_spec=pltpu.PrefetchScalarGridSpec(
            num_scalar_prefetch=0,
            grid=grid,
            in_specs=[
                # x: streamed, one batch tile per grid step (double-buffered).
                pl.BlockSpec((tb, IN_FEATURES), lambda i: (i, 0)),
                # Weights / biases: constant block index -> loaded once, resident.
                pl.BlockSpec((IN_FEATURES, HIDDEN_PAD), lambda i: (0, 0)),
                pl.BlockSpec((1, HIDDEN_PAD), lambda i: (0, 0)),
                pl.BlockSpec((HIDDEN_PAD, OUT_FEATURES), lambda i: (0, 0)),
                pl.BlockSpec((1, OUT_FEATURES), lambda i: (0, 0)),
            ],
            out_specs=pl.BlockSpec((tb, OUT_FEATURES), lambda i: (i, 0)),
        ),
        compiler_params=pltpu.CompilerParams(
            dimension_semantics=("parallel",),   # shard batch tiles across TCs (v7x)
            vmem_limit_bytes=56 << 20,           # headroom for 1024-row f32 tiles
        ),
        cost_estimate=cost,
    )(x_flat, w1_p, b1_p, w2_p, b2_2d)
    return out


def _reference(x, w1, b1, w2, b2):
    xf = x.reshape(x.shape[0], IN_FEATURES).astype(jnp.float32)
    h = jnp.tanh(xf @ w1 + b1[None, :])
    return h @ w2 + b2[None, :]


if __name__ == "__main__":
    key = jax.random.PRNGKey(0)
    k_x, k_w1, k_b1, k_w2, k_b2, k_x2 = jax.random.split(key, 6)

    # Deterministic parameter init mimicking nn.Linear's U(-1/sqrt(fan_in), ...).
    bound1 = 1.0 / (IN_FEATURES ** 0.5)
    w1 = jax.random.uniform(k_w1, (IN_FEATURES, HIDDEN), jnp.float32,
                            minval=-bound1, maxval=bound1)
    b1 = jax.random.uniform(k_b1, (HIDDEN,), jnp.float32,
                            minval=-bound1, maxval=bound1)
    bound2 = 1.0 / (HIDDEN ** 0.5)
    w2 = jax.random.uniform(k_w2, (HIDDEN, OUT_FEATURES), jnp.float32,
                            minval=-bound2, maxval=bound2)
    b2 = jax.random.uniform(k_b2, (OUT_FEATURES,), jnp.float32,
                            minval=-bound2, maxval=bound2)

    # --- small-batch check (B=2, single ragged 8-row tile, no padding pass) ---
    B = 2
    x = jax.random.normal(k_x, (B, 3, 32, 32), dtype=jnp.float32)
    out = jax.block_until_ready(two_layer(x, w1, b1, w2, b2))
    ref = _reference(x, w1, b1, w2, b2)
    assert out.shape == (B, OUT_FEATURES), out.shape
    assert jnp.allclose(out, ref, atol=1e-5, rtol=1e-5)

    # --- multi-tile check (B=20, block_b=8 -> grid of 3, ragged last block) ---
    B2 = 20
    x2 = jax.random.normal(k_x2, (B2, 3, 32, 32), dtype=jnp.float32)
    out2 = jax.block_until_ready(two_layer(x2, w1, b1, w2, b2, block_b=8))
    ref2 = _reference(x2, w1, b1, w2, b2)
    assert out2.shape == (B2, OUT_FEATURES), out2.shape
    assert jnp.allclose(out2, ref2, atol=1e-5, rtol=1e-5)

    # --- bf16 streaming path: producer hands bf16 x; wrapper does NOT cast ---
    x2_bf16 = x2.astype(jnp.bfloat16)            # "producer-side" cast, outside wrapper
    out_bf16 = jax.block_until_ready(
        two_layer(x2_bf16, w1, b1, w2, b2, block_b=8))   # tb clamped up to 16
    assert out_bf16.shape == (B2, OUT_FEATURES)
    assert jnp.allclose(out_bf16, ref2, atol=1e-1, rtol=1e-1)

    print("KERNEL_OK")
</pallas_src>

<mosaic_0001>
module attributes {stable_mosaic.version = 11 : i64} {
  func.func @_mlp_kernel(%arg0: i32, %arg1: memref<8x3072xf32, #tpu.memory_space<vmem>>, %arg2: memref<3072x128xf32, #tpu.memory_space<vmem>>, %arg3: memref<1x128xf32, #tpu.memory_space<vmem>>, %arg4: memref<128x10xf32, #tpu.memory_space<vmem>>, %arg5: memref<1x10xf32, #tpu.memory_space<vmem>>, %arg6: memref<8x10xf32, #tpu.memory_space<vmem>>) attributes {dimension_semantics = [#tpu.dimension_semantics<parallel>], iteration_bounds = array<i64: 1>, scalar_prefetch = 0 : i64, scratch_operands = 0 : i64, tpu.core_type = #tpu.core_type<tc>, window_params = [{transform_indices = @transform_0, window_bounds = array<i64: 8, 3072>}, {pipeline_mode = #tpu.pipeline_mode<synchronous>, transform_indices = @transform_1, window_bounds = array<i64: 3072, 128>}, {pipeline_mode = #tpu.pipeline_mode<synchronous>, transform_indices = @transform_2, window_bounds = array<i64: 1, 128>}, {pipeline_mode = #tpu.pipeline_mode<synchronous>, transform_indices = @transform_3, window_bounds = array<i64: 128, 10>}, {pipeline_mode = #tpu.pipeline_mode<synchronous>, transform_indices = @transform_4, window_bounds = array<i64: 1, 10>}, {transform_indices = @transform_5, window_bounds = array<i64: 8, 10>}]} {
    %c0 = arith.constant 0 : index
    %c0_0 = arith.constant 0 : index
    %0 = vector.load %arg1[%c0, %c0_0] : memref<8x3072xf32, #tpu.memory_space<vmem>>, vector<8x3072xf32>
    %c0_1 = arith.constant 0 : index
    %c0_2 = arith.constant 0 : index
    %1 = vector.load %arg2[%c0_1, %c0_2] : memref<3072x128xf32, #tpu.memory_space<vmem>>, vector<3072x128xf32>
    %cst = arith.constant dense<0.000000e+00> : vector<8x128xf32>
    %2 = tpu.matmul %0, %1, %cst {dimension_numbers = #tpu.dot_dimension_numbers<[1], [0], [0], [1], [0, 0, 1, 1], [], []>} : vector<8x3072xf32>, vector<3072x128xf32>, vector<8x128xf32> -> vector<8x128xf32>
    %c0_3 = arith.constant 0 : index
    %c0_4 = arith.constant 0 : index
    %3 = vector.load %arg3[%c0_3, %c0_4] : memref<1x128xf32, #tpu.memory_space<vmem>>, vector<1x128xf32>
    %4 = vector.broadcast %3 : vector<1x128xf32> to vector<8x128xf32>
    %5 = arith.addf %2, %4 : vector<8x128xf32>
    %6 = math.tanh %5 : vector<8x128xf32>
    %c0_5 = arith.constant 0 : index
    %c0_6 = arith.constant 0 : index
    %7 = vector.load %arg4[%c0_5, %c0_6] : memref<128x10xf32, #tpu.memory_space<vmem>>, vector<128x10xf32>
    %cst_7 = arith.constant dense<0.000000e+00> : vector<8x10xf32>
    %8 = tpu.matmul %6, %7, %cst_7 {dimension_numbers = #tpu.dot_dimension_numbers<[1], [0], [0], [1], [0, 0, 1, 1], [], []>} : vector<8x128xf32>, vector<128x10xf32>, vector<8x10xf32> -> vector<8x10xf32>
    %c0_8 = arith.constant 0 : index
    %c0_9 = arith.constant 0 : index
    %9 = vector.load %arg5[%c0_8, %c0_9] : memref<1x10xf32, #tpu.memory_space<vmem>>, vector<1x10xf32>
    %10 = vector.broadcast %9 : vector<1x10xf32> to vector<8x10xf32>
    %11 = arith.addf %8, %10 : vector<8x10xf32>
    %c0_10 = arith.constant 0 : index
    %c0_11 = arith.constant 0 : index
    %12 = vector.load %arg6[%c0_10, %c0_11] : memref<8x10xf32, #tpu.memory_space<vmem>>, vector<8x10xf32>
    tpu.vector_store %arg6[%c0_10, %c0_11], %11 {strides = array<i32>} : memref<8x10xf32, #tpu.memory_space<vmem>>, vector<8x10xf32>,
    return
  }
  func.func @transform_0(%arg0: i32) -> (i32, i32) {
    %c0_i32 = arith.constant 0 : i32
    %c0_i32_0 = arith.constant 0 : i32
    return %arg0, %c0_i32 : i32, i32
  }
  func.func @transform_1(%arg0: i32) -> (i32, i32) {
    %c0_i32 = arith.constant 0 : i32
    %c0_i32_0 = arith.constant 0 : i32
    %c0_i32_1 = arith.constant 0 : i32
    return %c0_i32, %c0_i32_0 : i32, i32
  }
  func.func @transform_2(%arg0: i32) -> (i32, i32) {
    %c0_i32 = arith.constant 0 : i32
    %c0_i32_0 = arith.constant 0 : i32
    %c0_i32_1 = arith.constant 0 : i32
    return %c0_i32, %c0_i32_0 : i32, i32
  }
  func.func @transform_3(%arg0: i32) -> (i32, i32) {
    %c0_i32 = arith.constant 0 : i32
    %c0_i32_0 = arith.constant 0 : i32
    %c0_i32_1 = arith.constant 0 : i32
    return %c0_i32, %c0_i32_0 : i32, i32
  }
  func.func @transform_4(%arg0: i32) -> (i32, i32) {
    %c0_i32 = arith.constant 0 : i32
    %c0_i32_0 = arith.constant 0 : i32
    %c0_i32_1 = arith.constant 0 : i32
    return %c0_i32, %c0_i32_0 : i32, i32
  }
  func.func @transform_5(%arg0: i32) -> (i32, i32) {
    %c0_i32 = arith.constant 0 : i32
    %c0_i32_0 = arith.constant 0 : i32
    return %arg0, %c0_i32 : i32, i32
  }
}

</mosaic_0001>

<bundles_post_ra>
// kernel: tpu_custom_call.1
= control target key start
LH: loop header
LB: loop body
LE: loop exit
PB: predicated region body
PF: predicated region fallthrough
CT: control target
= control target key end

     0   :  { %10 = vsyncpa [#allocation3], 0  ;;  %s3018_s0 = inlined_call_operand.hbm [shape: f32[2,3072], index: 0, kind: input, shape index: {}]   ;;  %s3019_s1 = inlined_call_operand.hbm [shape: f32[3072,128], index: 1, kind: input, shape index: {}]   ;;  %s3020_s2 = inlined_call_operand.hbm [shape: f32[1,128], index: 2, kind: input, shape index: {}]   ;;  %s3021_s3 = inlined_call_operand.vmem [shape: f32[128,10], index: 3, kind: input, shape index: {}]   ;;  %s3022_s4 = inlined_call_operand.hbm [shape: f32[1,10], index: 4, kind: input, shape index: {}]   ;;  %s3023_s5 = inlined_call_operand.hbm [shape: f32[2,10], index: 5, kind: output, shape index: {}]  }
   0x1   :  { %11 = vsyncpa [#allocation6], 0 }
   0x2   :  { %12 = vsyncpa [#allocation9], 0 }
   0x3   :  { %13 = vsyncpa [#allocation4], 0 }
   0x4   :  { %18 = vsyncadd [#allocation3], 2304  ;;  %s2759_s18 = smov [#allocation5]   ;;  %s2641_s22 = scalar_lea.hbm %s3019_s1, 49152 }
   0x5   :  { %s31_s19 = sshll.u32 %s2759_s18, 4  ;;  %p2642_p0 = scmp.ne.s32.totalorder %s3019_s1, %s2641_s22  ;;  %s32_s19 = int_to_ptr.vmem [resolvable:$true] %s31_s19 }
   0x6   :  { %p2645_p1 = scmp.lt.u32.totalorder %s2641_s22, %s3019_s1 }
   0x8   :  { %p2647_p2 = pnand %p2645_p1, %p2642_p0 }
   0xa   :  { %2650 = shalt.err (!%p2647_p2)
}
   0xb   :  { %s2651_s27 = scalar_lea.vmem %s32_s19, 49152  ;;  %p2656_p4 = scmp.lt.s32.totalorder %s32_s19, %s32_s19 }
   0xc   :  { %p2652_p3 = scmp.ne.s32.totalorder %s32_s19, %s2651_s27  ;;  %p2657_p5 = scmp.lt.s32.totalorder %s2651_s27, %s2651_s27 }
   0xe   :  { %p2658_p6 = por %p2657_p5, %p2656_p4 }
  0x10   :  { %p2659_p7 = pnand %p2658_p6, %p2652_p3 }
  0x12   :  { %2662 = shalt.err (!%p2659_p7)
}
  0x13   :  { %s2760_s28 = smov 128   ;;  %s2761_s29 = smov 8  }
  0x14   :  { %37 = dma.hbm_to_vmem [thread:$0]  %s3019_s1, 49152, %s32_s19, [#allocation6], %s2760_s28, %s2760_s28, %s2761_s29  }
  0x15   :  { %s2762_s7 = smov [#allocation2]   ;;  %s2663_s11 = scalar_lea.hbm %s3018_s0, 768 }
  0x16   :  { %s19_s8 = sshll.u32 %s2762_s7, 4  ;;  %p2664_p8 = scmp.ne.s32.totalorder %s3018_s0, %s2663_s11  ;;  %s20_s8 = int_to_ptr.vmem [resolvable:$true] %s19_s8 }
  0x17   :  { %p2667_p9 = scmp.lt.u32.totalorder %s2663_s11, %s3018_s0 }
  0x19   :  { %p2669_p10 = pnand %p2667_p9, %p2664_p8 }
  0x1b   :  { %2672 = shalt.err (!%p2669_p10)
}
  0x1c   :  { %s2673_s16 = scalar_lea.vmem %s20_s8, 768  ;;  %s2677_s1 = scalar_lea.vmem %s20_s8, 3072 }
  0x1d   :  { %p2674_p11 = scmp.ne.s32.totalorder %s20_s8, %s2673_s16  ;;  %p2678_p12 = scmp.lt.s32.totalorder %s20_s8, %s20_s8 }
  0x1e   :  { %p2679_p13 = scmp.lt.s32.totalorder %s2677_s1, %s2673_s16 }
  0x20   :  { %p2680_p0 = por %p2679_p13, %p2678_p12 }
  0x22   :  { %p2681_p1 = pnand %p2680_p0, %p2674_p11 }
  0x24   :  { %2684 = shalt.err (!%p2681_p1)
}
  0x25   :  { %s2763_s17 = smov 768   ;;  %s2764_s18 = smov 48  }
  0x26   :  { %25 = dma.hbm_to_vmem [thread:$0]  %s3018_s0, 768, %s20_s8, [#allocation3], %s2763_s17, %s2763_s17, %s2764_s18  }
  0x27   :  { %s2765_s21 = smov [#allocation7]   ;;  %s2766_s23 = smov [#allocation8]  }
  0x28   :  { %s44_s22 = sshll.u32 %s2765_s21, 4  ;;  %s56_s24 = sshll.u32 %s2766_s23, 4  ;;  %s45_s22 = int_to_ptr.vmem [resolvable:$true] %s44_s22  ;;  %s57_s24 = int_to_ptr.vmem [resolvable:$true] %s56_s24 }
  0x29   :  { %s2685_s27 = scalar_lea.hbm %s3020_s2, 16 }
  0x2a   :  { %p2686_p2 = scmp.ne.s32.totalorder %s3020_s2, %s2685_s27  ;;  %p2689_p3 = scmp.lt.u32.totalorder %s2685_s27, %s3020_s2 }
  0x2c   :  { %p2691_p4 = pnand %p2689_p3, %p2686_p2 }
  0x2e   :  { %2694 = shalt.err (!%p2691_p4)
}
  0x2f   :  { %s2695_s0 = scalar_lea.vmem %s45_s22, 16  ;;  %s2699_s7 = scalar_lea.vmem %s45_s22, 32 }
  0x30   :  { %p2696_p5 = scmp.ne.s32.totalorder %s45_s22, %s2695_s0  ;;  %p2700_p6 = scmp.lt.s32.totalorder %s45_s22, %s45_s22 }
  0x31   :  { %p2701_p7 = scmp.lt.s32.totalorder %s2699_s7, %s2695_s0 }
  0x33   :  { %p2702_p8 = por %p2701_p7, %p2700_p6 }
  0x35   :  { %p2703_p9 = pnand %p2702_p8, %p2696_p5 }
  0x37   :  { %2706 = shalt.err (!%p2703_p9)
}
  0x38   :  { %47 = dma.hbm_to_vmem [thread:$0]  %s3020_s2, 16, %s45_s22, [#allocation6]  }
  0x39   :  { %s2707_s12 = scalar_lea.hbm %s3022_s4, 16 }
  0x3a   :  { %p2708_p10 = scmp.ne.s32.totalorder %s3022_s4, %s2707_s12  ;;  %p2711_p11 = scmp.lt.u32.totalorder %s2707_s12, %s3022_s4 }
  0x3c   :  { %p2713_p12 = pnand %p2711_p11, %p2708_p10 }
  0x3e   :  { %2716 = shalt.err (!%p2713_p12)
}
  0x3f   :  { %s2717_s1 = scalar_lea.vmem %s57_s24, 16  ;;  %s2721_s17 = scalar_lea.vmem %s57_s24, 32 }
  0x40   :  { %p2718_p13 = scmp.ne.s32.totalorder %s57_s24, %s2717_s1  ;;  %p2722_p0 = scmp.lt.s32.totalorder %s57_s24, %s57_s24 }
  0x41   :  { %p2723_p1 = scmp.lt.s32.totalorder %s2721_s17, %s2717_s1 }
  0x43   :  { %p2724_p2 = por %p2723_p1, %p2722_p0 }
  0x45   :  { %p2725_p3 = pnand %p2724_p2, %p2718_p13 }
  0x47   :  { %2728 = shalt.err (!%p2725_p3)
}
  0x48   :  { %59 = dma.hbm_to_vmem [thread:$0]  %s3022_s4, 16, %s57_s24, [#allocation9]  }
  0x49   :  { %2751 = dma.done.wait [#allocation3], 3072  }
  0x4a   :  { %2752 = vsyncadd [#allocation3], 4294964224 }
  0x4b   :  { %2753 = dma.done.wait [#allocation6], 49168  }
  0x4c   :  { %2754 = vsyncadd [#allocation6], 4294918128 }
  0x4d   :  { %2755 = dma.done.wait [#allocation9], 16  }
  0x4e   :  { %2756 = vsyncadd [#allocation9], 4294967280  ;;  %v112_v0 = vld [vmem:[#allocation5 + $0x80] sm:$0xff]  ;;  %v113_v1 = vld [vmem:[#allocation5 + $0x88] sm:$0xff]  ;;  %v2767_v51 = vmov 1983009808   ;;  %v518_v53 = vlaneseq }
  0x4f   :  { %v96_v2 = vld [vmem:[#allocation5] sm:$0xff]  ;;  %v2180_v3 = vpack.c.bf16 %v113_v1, %v112_v0  ;;  %v97_v4 = vld [vmem:[#allocation5 + $0x8] sm:$0xff]  ;;  %v114_v11 = vld [vmem:[#allocation5 + $0x90] sm:$0xff]  ;;  %v516_v52 = vunpack.c.l.s4 %v2767_v51  ;;  %vm2769_vm0 = vmmov 0   ;;  %vm1685_vm1 = vcmask 80896  }
  0x50   :  { %v144_v5 = vld [vmem:[#allocation5 + $0x180] sm:$0xff]  ;;  %v145_v6 = vld [vmem:[#allocation5 + $0x188] sm:$0xff]  ;;  %v2182_v7 = vpack.c.bf16 %v97_v4, %v96_v2  ;;  %v115_v13 = vld [vmem:[#allocation5 + $0x98] sm:$0xff] }
  0x51   :  { %v2212_v8 = vpack.c.bf16 %v145_v6, %v144_v5  ;;  %v128_v9 = vld [vmem:[#allocation5 + $0x100] sm:$0xff]  ;;  %v129_v10 = vld [vmem:[#allocation5 + $0x108] sm:$0xff]  ;;  %2181 = vmatprep.subr.bf16.mxu0 %v2180_v3  ;;  %v98_v14 = vld [vmem:[#allocation5 + $0x10] sm:$0xff]  ;;  %v2184_v16 = vpack.c.bf16 %v115_v13, %v114_v11  ;;  %v517_v2 = vunpack.c.0.s8 %v516_v52  ;;  %v519_v3 = vshrl.u32 %v518_v53, 7 }
  0x52   :  { %v2214_v12 = vpack.c.bf16 %v129_v10, %v128_v9  ;;  %v99_v15 = vld [vmem:[#allocation5 + $0x18] sm:$0xff]  ;;  %2183 = vmatpush3.bf16.msra.mxu0 %v2182_v7  ;;  %v146_v18 = vld [vmem:[#allocation5 + $0x190] sm:$0xff]  ;;  %v116_v23 = vld [vmem:[#allocation5 + $0xa0] sm:$0xff] }
  0x53   :  { %2213 = vmatprep.subr.bf16.mxu1 %v2212_v8  ;;  %v2186_v17 = vpack.c.bf16 %v99_v15, %v98_v14  ;;  %v147_v19 = vld [vmem:[#allocation5 + $0x198] sm:$0xff]  ;;  %v130_v20 = vld [vmem:[#allocation5 + $0x110] sm:$0xff]  ;;  %v117_v24 = vld [vmem:[#allocation5 + $0xa8] sm:$0xff]  ;;  %2185 = vmatprep.subr.bf16.mxu0 %v2184_v16 }
  0x54   :  { %2215 = vmatpush3.bf16.msra.mxu1 %v2214_v12  ;;  %v2216_v21 = vpack.c.bf16 %v147_v19, %v146_v18  ;;  %v131_v22 = vld [vmem:[#allocation5 + $0x118] sm:$0xff]  ;;  %v2188_v26 = vpack.c.bf16 %v117_v24, %v116_v23  ;;  %v100_v27 = vld [vmem:[#allocation5 + $0x20] sm:$0xff]  ;;  %v101_v28 = vld [vmem:[#allocation5 + $0x28] sm:$0xff] }
  0x55   :  { %v2218_v25 = vpack.c.bf16 %v131_v22, %v130_v20  ;;  %v148_v29 = vld [vmem:[#allocation5 + $0x1a0] sm:$0xff]  ;;  %v149_v30 = vld [vmem:[#allocation5 + $0x1a8] sm:$0xff]  ;;  %v2190_v33 = vpack.c.bf16 %v101_v28, %v100_v27  ;;  %v118_v35 = vld [vmem:[#allocation5 + $0xb0] sm:$0xff] }
  0x56   :  { %2217 = vmatprep.subr.bf16.mxu1 %v2216_v21  ;;  %v132_v31 = vld [vmem:[#allocation5 + $0x120] sm:$0xff]  ;;  %v133_v32 = vld [vmem:[#allocation5 + $0x128] sm:$0xff]  ;;  %2187 = vmatpush3.bf16.msra.mxu0 %v2186_v17  ;;  %v2220_v34 = vpack.c.bf16 %v149_v30, %v148_v29  ;;  %v119_v36 = vld [vmem:[#allocation5 + $0xb8] sm:$0xff]  ;;  %v2852_v21 = vsub.s32 %v517_v2, %v519_v3 }
  0x57   :  { %v102_v37 = vld [vmem:[#allocation5 + $0x30] sm:$0xff]  ;;  %2189 = vmatprep.subr.bf16.mxu0 %v2188_v26  ;;  %v2222_v38 = vpack.c.bf16 %v133_v32, %v132_v31  ;;  %v2192_v39 = vpack.c.bf16 %v119_v36, %v118_v35  ;;  %v103_v40 = vld [vmem:[#allocation5 + $0x38] sm:$0xff]  ;;  %v120_v46 = vld [vmem:[#allocation5 + $0xc0] sm:$0xff] }
  0x58   :  { %2219 = vmatpush3.bf16.msra.mxu1 %v2218_v25  ;;  %v150_v41 = vld [vmem:[#allocation5 + $0x1b0] sm:$0xff]  ;;  %v151_v42 = vld [vmem:[#allocation5 + $0x1b8] sm:$0xff]  ;;  %v121_v47 = vld [vmem:[#allocation5 + $0xc8] sm:$0xff]  ;;  %v2194_v48 = vpack.c.bf16 %v103_v40, %v102_v37 }
  0x59   :  { %2221 = vmatprep.subr.bf16.mxu1 %v2220_v34  ;;  %v2224_v43 = vpack.c.bf16 %v151_v42, %v150_v41  ;;  %v134_v44 = vld [vmem:[#allocation5 + $0x130] sm:$0xff]  ;;  %v135_v45 = vld [vmem:[#allocation5 + $0x138] sm:$0xff]  ;;  %v152_v49 = vld [vmem:[#allocation5 + $0x1c0] sm:$0xff]  ;;  %v2196_v55 = vpack.c.bf16 %v121_v47, %v120_v46 }
  0x5a   :  { %2191 = vmatpush3.bf16.msra.mxu0 %v2190_v33  ;;  %v153_v50 = vld [vmem:[#allocation5 + $0x1c8] sm:$0xff]  ;;  %v2226_v54 = vpack.c.bf16 %v135_v45, %v134_v44  ;;  %v104_v56 = vld [vmem:[#allocation5 + $0x40] sm:$0xff]  ;;  %v122_v61 = vld [vmem:[#allocation5 + $0xd0] sm:$0xff] }
  0x5b   :  { %2193 = vmatprep.subr.bf16.mxu0 %v2192_v39  ;;  %v105_v57 = vld [vmem:[#allocation5 + $0x48] sm:$0xff]  ;;  %v136_v58 = vld [vmem:[#allocation5 + $0x140] sm:$0xff]  ;;  %v2228_v59 = vpack.c.bf16 %v153_v50, %v152_v49  ;;  %v123_v62 = vld [vmem:[#allocation5 + $0xd8] sm:$0xff] }
  0x5c   :  { %2223 = vmatpush3.bf16.msra.mxu1 %v2222_v38  ;;  %v137_v60 = vld [vmem:[#allocation5 + $0x148] sm:$0xff]  ;;  %v154_v63 = vld [vmem:[#allocation5 + $0x1d0] sm:$0xff]  ;;  %v155_v0 = vld [vmem:[#allocation5 + $0x1d8] sm:$0xff]  ;;  %v2198_v1 = vpack.c.bf16 %v105_v57, %v104_v56  ;;  %v2200_v5 = vpack.c.bf16 %v123_v62, %v122_v61 }
  0x5d   :  { %2225 = vmatprep.subr.bf16.mxu1 %v2224_v43  ;;  %v2230_v4 = vpack.c.bf16 %v137_v60, %v136_v58  ;;  %v106_v6 = vld [vmem:[#allocation5 + $0x50] sm:$0xff]  ;;  %v107_v7 = vld [vmem:[#allocation5 + $0x58] sm:$0xff]  ;;  %v2232_v9 = vpack.c.bf16 %v155_v0, %v154_v63  ;;  %v124_v11 = vld [vmem:[#allocation5 + $0xe0] sm:$0xff] }
  0x5e   :  { %2195 = vmatpush3.bf16.msra.mxu0 %v2194_v48  ;;  %v138_v8 = vld [vmem:[#allocation5 + $0x150] sm:$0xff]  ;;  %v139_v10 = vld [vmem:[#allocation5 + $0x158] sm:$0xff]  ;;  %v125_v12 = vld [vmem:[#allocation5 + $0xe8] sm:$0xff]  ;;  %v2202_v17 = vpack.c.bf16 %v107_v7, %v106_v6 }
  0x5f   :  { %2197 = vmatprep.subr.bf16.mxu0 %v2196_v55  ;;  %v108_v13 = vld [vmem:[#allocation5 + $0x60] sm:$0xff]  ;;  %v109_v14 = vld [vmem:[#allocation5 + $0x68] sm:$0xff]  ;;  %v126_v20 = vld [vmem:[#allocation5 + $0xf0] sm:$0xff]  ;;  %v2234_v22 = vpack.c.bf16 %v139_v10, %v138_v8  ;;  %v2204_v23 = vpack.c.bf16 %v125_v12, %v124_v11 }
  0x60   :  { %2227 = vmatpush3.bf16.msra.mxu1 %v2226_v54  ;;  %v156_v15 = vld [vmem:[#allocation5 + $0x1e0] sm:$0xff]  ;;  %v157_v16 = vld [vmem:[#allocation5 + $0x1e8] sm:$0xff]  ;;  %v127_v24 = vld [vmem:[#allocation5 + $0xf8] sm:$0xff]  ;;  %v2206_v30 = vpack.c.bf16 %v109_v14, %v108_v13 }
  0x61   :  { %2229 = vmatprep.subr.bf16.mxu1 %v2228_v59  ;;  %v140_v18 = vld [vmem:[#allocation5 + $0x160] sm:$0xff]  ;;  %v141_v19 = vld [vmem:[#allocation5 + $0x168] sm:$0xff]  ;;  %v2236_v25 = vpack.c.bf16 %v157_v16, %v156_v15  ;;  %v158_v27 = vld [vmem:[#allocation5 + $0x1f0] sm:$0xff]  ;;  %v2208_v35 = vpack.c.bf16 %v127_v24, %v126_v20 }
  0x62   :  { %2199 = vmatpush3.bf16.msra.mxu0 %v2198_v1  ;;  %v2603_v26 = vld [vmem:[#allocation2] ss:$48 sps:$4 sm:$0xff]   ;;  %v159_v28 = vld [vmem:[#allocation5 + $0x1f8] sm:$0xff]  ;;  %v2607_v32 = vld [vmem:[#allocation2 + $0x4] ss:$48 sps:$4 sm:$0xff]   ;;  %v2238_v34 = vpack.c.bf16 %v141_v19, %v140_v18 }
  0x63   :  { %2201 = vmatprep.subr.bf16.mxu0 %v2200_v5  ;;  %v2605_v29 = vld [vmem:[#allocation2 + $0x60] ss:$48 sps:$4 sm:$0xff]   ;;  %v521_v31 = vrot.slane %v2603_v26, %v2852_v21  ;;  %v2608_v33 = vld [vmem:[#allocation2 + $0x64] ss:$48 sps:$4 sm:$0xff]   ;;  %v111_v37 = vld [vmem:[#allocation5 + $0x78] sm:$0xff]  ;;  %v2240_v40 = vpack.c.bf16 %v159_v28, %v158_v27  ;;  %v528_v44 = vrot.slane %v2607_v32, %v2852_v21 }
  0x64   :  { %2231 = vmatpush3.bf16.msra.mxu1 %v2230_v4  ;;  %v110_v36 = vld [vmem:[#allocation5 + $0x70] sm:$0xff]  ;;  %v535_v39 = vrot.slane %v2605_v29, %v2852_v21  ;;  %v143_v41 = vld [vmem:[#allocation5 + $0x178] sm:$0xff]  ;;  %v176_v42 = vld [vmem:[#allocation5 + $0x280] sm:$0xff]  ;;  %v542_v45 = vrot.slane %v2608_v33, %v2852_v21 }
  0x65   :  { %2233 = vmatprep.subr.bf16.mxu1 %v2232_v9  ;;  %v142_v38 = vld [vmem:[#allocation5 + $0x170] sm:$0xff]  ;;  %v177_v43 = vld [vmem:[#allocation5 + $0x288] sm:$0xff]  ;;  %v208_v47 = vld [vmem:[#allocation5 + $0x380] sm:$0xff]  ;;  %v2210_v49 = vpack.c.bf16 %v111_v37, %v110_v36 }
  0x66   :  { %2203 = vmatpush3.bf16.msra.mxu0 %v2202_v17  ;;  %v544_v46 = vcombine.high %v521_v31, %v535_v39  ;;  %v209_v48 = vld [vmem:[#allocation5 + $0x388] sm:$0xff]  ;;  %v546_v50 = vcombine.high %v528_v44, %v542_v45  ;;  %v2242_v51 = vpack.c.bf16 %v143_v41, %v142_v38  ;;  %v2244_v52 = vpack.c.bf16 %v177_v43, %v176_v42  ;;  %v160_v53 = vld [vmem:[#allocation5 + $0x200] sm:$0xff]  ;;  %v178_v58 = vld [vmem:[#allocation5 + $0x290] sm:$0xff] }
  0x67   :  { %2205 = vmatprep.subr.bf16.mxu0 %v2204_v23  ;;  %v161_v54 = vld [vmem:[#allocation5 + $0x208] sm:$0xff]  ;;  %v192_v55 = vld [vmem:[#allocation5 + $0x300] sm:$0xff]  ;;  %v2276_v56 = vpack.c.bf16 %v209_v48, %v208_v47  ;;  %v179_v59 = vld [vmem:[#allocation5 + $0x298] sm:$0xff]  ;;  %v543_v60 = vcombine.low %v521_v31, %v535_v39  ;;  %v545_v0 = vcombine.low %v528_v44, %v542_v45 }
  0x68   :  { %2235 = vmatpush3.bf16.msra.mxu1 %v2234_v22  ;;  %815 = vmatprep.mubr.f32.mxu0 %v544_v46  ;;  %v193_v57 = vld [vmem:[#allocation5 + $0x308] sm:$0xff]  ;;  %v210_v61 = vld [vmem:[#allocation5 + $0x390] sm:$0xff]  ;;  %v211_v62 = vld [vmem:[#allocation5 + $0x398] sm:$0xff]  ;;  %v2246_v63 = vpack.c.bf16 %v161_v54, %v160_v53  ;;  %v2248_v2 = vpack.c.bf16 %v179_v59, %v178_v58 }
  0x69   :  { %2237 = vmatprep.subr.bf16.mxu1 %v2236_v25  ;;  %885 = vmatprep.mubr.f32.mxu1 %v546_v50  ;;  %v2278_v1 = vpack.c.bf16 %v193_v57, %v192_v55  ;;  %v162_v3 = vld [vmem:[#allocation5 + $0x210] sm:$0xff]  ;;  %v163_v4 = vld [vmem:[#allocation5 + $0x218] sm:$0xff]  ;;  %v2280_v6 = vpack.c.bf16 %v211_v62, %v210_v61  ;;  %v180_v8 = vld [vmem:[#allocation5 + $0x2a0] sm:$0xff] }
  0x6a   :  { %2207 = vmatpush3.bf16.msra.mxu0 %v2206_v30  ;;  %v194_v5 = vld [vmem:[#allocation5 + $0x310] sm:$0xff]  ;;  %v195_v7 = vld [vmem:[#allocation5 + $0x318] sm:$0xff]  ;;  %v181_v9 = vld [vmem:[#allocation5 + $0x2a8] sm:$0xff]  ;;  %v2250_v12 = vpack.c.bf16 %v163_v4, %v162_v3 }
  0x6b   :  { %2209 = vmatprep.subr.bf16.mxu0 %v2208_v35  ;;  %v212_v10 = vld [vmem:[#allocation5 + $0x3a0] sm:$0xff]  ;;  %v213_v11 = vld [vmem:[#allocation5 + $0x3a8] sm:$0xff]  ;;  %v2282_v13 = vpack.c.bf16 %v195_v7, %v194_v5  ;;  %v2252_v14 = vpack.c.bf16 %v181_v9, %v180_v8  ;;  %v182_v20 = vld [vmem:[#allocation5 + $0x2b0] sm:$0xff] }
  0x6c   :  { %2239 = vmatpush3.bf16.msra.mxu1 %v2238_v34  ;;  %v164_v15 = vld [vmem:[#allocation5 + $0x220] sm:$0xff]  ;;  %v165_v16 = vld [vmem:[#allocation5 + $0x228] sm:$0xff]  ;;  %v2284_v18 = vpack.c.bf16 %v213_v11, %v212_v10  ;;  %v183_v22 = vld [vmem:[#allocation5 + $0x2b8] sm:$0xff] }
  0x6d   :  { %2241 = vmatprep.subr.bf16.mxu1 %v2240_v40  ;;  %v196_v17 = vld [vmem:[#allocation5 + $0x320] sm:$0xff]  ;;  %v197_v19 = vld [vmem:[#allocation5 + $0x328] sm:$0xff]  ;;  %v214_v23 = vld [vmem:[#allocation5 + $0x3b0] sm:$0xff]  ;;  %v2254_v25 = vpack.c.bf16 %v165_v16, %v164_v15  ;;  %v2256_v27 = vpack.c.bf16 %v183_v22, %v182_v20 }
  0x6e   :  { %2211 = vmatpush3.bf16.msra.mxu0 %v2210_v49  ;;  %v215_v24 = vld [vmem:[#allocation5 + $0x3b8] sm:$0xff]  ;;  %v2286_v26 = vpack.c.bf16 %v197_v19, %v196_v17  ;;  %v166_v28 = vld [vmem:[#allocation5 + $0x230] sm:$0xff]  ;;  %v184_v33 = vld [vmem:[#allocation5 + $0x2c0] sm:$0xff] }
  0x6f   :  { %2245 = vmatprep.subr.bf16.mxu0 %v2244_v52  ;;  %v167_v29 = vld [vmem:[#allocation5 + $0x238] sm:$0xff]  ;;  %v198_v30 = vld [vmem:[#allocation5 + $0x330] sm:$0xff]  ;;  %v2288_v31 = vpack.c.bf16 %v215_v24, %v214_v23  ;;  %v185_v34 = vld [vmem:[#allocation5 + $0x2c8] sm:$0xff] }
  0x70   :  { %2243 = vmatpush3.bf16.msra.mxu1 %v2242_v51  ;;  %v199_v32 = vld [vmem:[#allocation5 + $0x338] sm:$0xff]  ;;  %v168_v35 = vld [vmem:[#allocation5 + $0x240] sm:$0xff]  ;;  %v169_v36 = vld [vmem:[#allocation5 + $0x248] sm:$0xff]  ;;  %v2258_v39 = vpack.c.bf16 %v167_v29, %v166_v28  ;;  %v2260_v44 = vpack.c.bf16 %v185_v34, %v184_v33 }
  0x71   :  { %2277 = vmatprep.subr.bf16.mxu1 %v2276_v56  ;;  %816 = vmatmul.mubr.f32.vlgmr.msra.gmra.mrb[0].mxu0 %v543_v60  ;;  %v216_v37 = vld [vmem:[#allocation5 + $0x3c0] sm:$0xff]  ;;  %v217_v38 = vld [vmem:[#allocation5 + $0x3c8] sm:$0xff]  ;;  %v186_v42 = vld [vmem:[#allocation5 + $0x2d0] sm:$0xff]  ;;  %v2290_v43 = vpack.c.bf16 %v199_v32, %v198_v30  ;;  %v2262_v51 = vpack.c.bf16 %v169_v36, %v168_v35 }
  0x72   :  { %2247 = vmatpush3.bf16.msra.mxu0 %v2246_v63  ;;  %v200_v40 = vld [vmem:[#allocation5 + $0x340] sm:$0xff]  ;;  %v201_v41 = vld [vmem:[#allocation5 + $0x348] sm:$0xff]  ;;  %v187_v45 = vld [vmem:[#allocation5 + $0x2d8] sm:$0xff]  ;;  %v2292_v46 = vpack.c.bf16 %v217_v38, %v216_v37 }
  0x73   :  { %886 = vmatmul.mubr.f32.vlgmr.msra.gmra.mrb[0].mxu1 %v545_v0  ;;  %2249 = vmatprep.subr.bf16.mxu0 %v2248_v2  ;;  %v2609_v47 = vld [vmem:[#allocation2 + $0x8] ss:$48 sps:$4 sm:$0xff]   ;;  %v218_v48 = vld [vmem:[#allocation5 + $0x3d0] sm:$0xff]  ;;  %v2613_v53 = vld [vmem:[#allocation2 + $0xc] ss:$48 sps:$4 sm:$0xff]   ;;  %v2294_v55 = vpack.c.bf16 %v201_v41, %v200_v40  ;;  %v2264_v56 = vpack.c.bf16 %v187_v45, %v186_v42 }
  0x74   :  { %2279 = vmatpush3.bf16.msra.mxu1 %v2278_v1  ;;  %v219_v49 = vld [vmem:[#allocation5 + $0x3d8] sm:$0xff]  ;;  %v2859_v52 = vrot.slane %v2609_v47, %v2852_v21  ;;  %v170_v57 = vld [vmem:[#allocation5 + $0x250] sm:$0xff]  ;;  %v188_v63 = vld [vmem:[#allocation5 + $0x2e0] sm:$0xff]  ;;  %v2865_v1 = vrot.slane %v2613_v53, %v2852_v21 }
  0x75   :  { %2281 = vmatprep.subr.bf16.mxu1 %v2280_v6  ;;  %v2611_v50 = vld [vmem:[#allocation2 + $0x68] ss:$48 sps:$4 sm:$0xff]   ;;  %v2614_v54 = vld [vmem:[#allocation2 + $0x6c] ss:$48 sps:$4 sm:$0xff]   ;;  %v202_v59 = vld [vmem:[#allocation5 + $0x350] sm:$0xff]  ;;  %v2296_v61 = vpack.c.bf16 %v219_v49, %v218_v48 }
  0x76   :  { %2251 = vmatpush3.bf16.msra.mxu0 %v2250_v12  ;;  %v171_v58 = vld [vmem:[#allocation5 + $0x258] sm:$0xff]  ;;  %v2862_v60 = vrot.slane %v2611_v50, %v2852_v21  ;;  %v189_v0 = vld [vmem:[#allocation5 + $0x2e8] sm:$0xff]  ;;  %v2868_v2 = vrot.slane %v2614_v54, %v2852_v21  ;;  %v220_v3 = vld [vmem:[#allocation5 + $0x3e0] sm:$0xff] }
  0x77   :  { %2253 = vmatprep.subr.bf16.mxu0 %v2252_v14  ;;  %v203_v62 = vld [vmem:[#allocation5 + $0x358] sm:$0xff]  ;;  %v221_v4 = vld [vmem:[#allocation5 + $0x3e8] sm:$0xff]  ;;  %v2266_v6 = vpack.c.bf16 %v171_v58, %v170_v57  ;;  %v2268_v9 = vpack.c.bf16 %v189_v0, %v188_v63  ;;  %v172_v10 = vld [vmem:[#allocation5 + $0x260] sm:$0xff] }
  0x78   :  { %2283 = vmatpush3.bf16.msra.mxu1 %v2282_v13  ;;  %v580_v5 = vcombine.high %v2859_v52, %v2862_v60  ;;  %v582_v7 = vcombine.high %v2865_v1, %v2868_v2  ;;  %v2298_v8 = vpack.c.bf16 %v203_v62, %v202_v59  ;;  %v173_v11 = vld [vmem:[#allocation5 + $0x268] sm:$0xff]  ;;  %v204_v12 = vld [vmem:[#allocation5 + $0x360] sm:$0xff]  ;;  %v2300_v13 = vpack.c.bf16 %v221_v4, %v220_v3  ;;  %v190_v15 = vld [vmem:[#allocation5 + $0x2f0] sm:$0xff] }
  0x79   :  { %2285 = vmatprep.subr.bf16.mxu1 %v2284_v18  ;;  %v205_v14 = vld [vmem:[#allocation5 + $0x368] sm:$0xff]  ;;  %v191_v16 = vld [vmem:[#allocation5 + $0x2f8] sm:$0xff]  ;;  %v222_v17 = vld [vmem:[#allocation5 + $0x3f0] sm:$0xff]  ;;  %v2270_v19 = vpack.c.bf16 %v173_v11, %v172_v10  ;;  %v579_v42 = vcombine.low %v2859_v52, %v2862_v60 }
  0x7a   :  { %2255 = vmatpush3.bf16.msra.mxu0 %v2254_v25  ;;  %955 = vmatprep.mubr.f32.mxu0 %v580_v5  ;;  %v223_v18 = vld [vmem:[#allocation5 + $0x3f8] sm:$0xff]  ;;  %v2302_v20 = vpack.c.bf16 %v205_v14, %v204_v12  ;;  %v2272_v22 = vpack.c.bf16 %v191_v16, %v190_v15  ;;  %v174_v23 = vld [vmem:[#allocation5 + $0x270] sm:$0xff]  ;;  %v240_v28 = vld [vmem:[#allocation5 + $0x480] sm:$0xff] }
  0x7b   :  { %2257 = vmatprep.subr.bf16.mxu0 %v2256_v27  ;;  %1025 = vmatprep.mubr.f32.mxu1 %v582_v7  ;;  %v175_v24 = vld [vmem:[#allocation5 + $0x278] sm:$0xff]  ;;  %v206_v25 = vld [vmem:[#allocation5 + $0x370] sm:$0xff]  ;;  %v241_v29 = vld [vmem:[#allocation5 + $0x488] sm:$0xff] }
  0x7c   :  { %2287 = vmatpush3.bf16.msra.mxu1 %v2286_v26  ;;  %v2304_v26 = vpack.c.bf16 %v223_v18, %v222_v17  ;;  %v207_v27 = vld [vmem:[#allocation5 + $0x378] sm:$0xff]  ;;  %v272_v30 = vld [vmem:[#allocation5 + $0x580] sm:$0xff]  ;;  %v2274_v32 = vpack.c.bf16 %v175_v24, %v174_v23  ;;  %v2308_v34 = vpack.c.bf16 %v241_v29, %v240_v28  ;;  %v225_v36 = vld [vmem:[#allocation5 + $0x408] sm:$0xff] }
  0x7d   :  { %2289 = vmatprep.subr.bf16.mxu1 %v2288_v31  ;;  %v273_v31 = vld [vmem:[#allocation5 + $0x588] sm:$0xff]  ;;  %v2306_v33 = vpack.c.bf16 %v207_v27, %v206_v25  ;;  %v224_v35 = vld [vmem:[#allocation5 + $0x400] sm:$0xff]  ;;  %v242_v40 = vld [vmem:[#allocation5 + $0x490] sm:$0xff] }
  0x7e   :  { %2259 = vmatpush3.bf16.msra.mxu0 %v2258_v39  ;;  %v256_v37 = vld [vmem:[#allocation5 + $0x500] sm:$0xff]  ;;  %v2340_v38 = vpack.c.bf16 %v273_v31, %v272_v30  ;;  %v257_v39 = vld [vmem:[#allocation5 + $0x508] sm:$0xff]  ;;  %v243_v41 = vld [vmem:[#allocation5 + $0x498] sm:$0xff]  ;;  %v2310_v45 = vpack.c.bf16 %v225_v36, %v224_v35 }
  0x7f   :  { %2261 = vmatprep.subr.bf16.mxu0 %v2260_v44  ;;  %v275_v44 = vld [vmem:[#allocation5 + $0x598] sm:$0xff]  ;;  %v2342_v47 = vpack.c.bf16 %v257_v39, %v256_v37  ;;  %v2312_v48 = vpack.c.bf16 %v243_v41, %v242_v40  ;;  %v226_v49 = vld [vmem:[#allocation5 + $0x410] sm:$0xff]  ;;  %v228_v52 = vld [vmem:[#allocation5 + $0x420] sm:$0xff] }
  0x80   :  { %2291 = vmatpush3.bf16.msra.mxu1 %v2290_v43  ;;  %v274_v43 = vld [vmem:[#allocation5 + $0x590] sm:$0xff]  ;;  %v227_v50 = vld [vmem:[#allocation5 + $0x418] sm:$0xff]  ;;  %v229_v57 = vld [vmem:[#allocation5 + $0x428] sm:$0xff] }
  0x81   :  { %2293 = vmatprep.subr.bf16.mxu1 %v2292_v46  ;;  %v581_v46 = vcombine.low %v2865_v1, %v2868_v2  ;;  %v2344_v53 = vpack.c.bf16 %v275_v44, %v274_v43  ;;  %v259_v54 = vld [vmem:[#allocation5 + $0x518] sm:$0xff]  ;;  %v276_v58 = vld [vmem:[#allocation5 + $0x5a0] sm:$0xff]  ;;  %v277_v59 = vld [vmem:[#allocation5 + $0x5a8] sm:$0xff]  ;;  %v2314_v60 = vpack.c.bf16 %v227_v50, %v226_v49 }
  0x82   :  { %2263 = vmatpush3.bf16.msra.mxu0 %v2262_v51  ;;  %v258_v51 = vld [vmem:[#allocation5 + $0x510] sm:$0xff]  ;;  %v261_v62 = vld [vmem:[#allocation5 + $0x528] sm:$0xff]  ;;  %v247_v2 = vld [vmem:[#allocation5 + $0x4b8] sm:$0xff]  ;;  %v2348_v3 = vpack.c.bf16 %v277_v59, %v276_v58 }
  0x83   :  { %2265 = vmatprep.subr.bf16.mxu0 %v2264_v56  ;;  %v245_v56 = vld [vmem:[#allocation5 + $0x4a8] sm:$0xff]  ;;  %v246_v63 = vld [vmem:[#allocation5 + $0x4b0] sm:$0xff]  ;;  %v2346_v0 = vpack.c.bf16 %v259_v54, %v258_v51  ;;  %v231_v15 = vld [vmem:[#allocation5 + $0x438] sm:$0xff] }
  0x84   :  { %2295 = vmatpush3.bf16.msra.mxu1 %v2294_v55  ;;  %v244_v55 = vld [vmem:[#allocation5 + $0x4a0] sm:$0xff]  ;;  %v278_v5 = vld [vmem:[#allocation5 + $0x5b0] sm:$0xff]  ;;  %v265_v36 = vld [vmem:[#allocation5 + $0x548] sm:$0xff] }
  0x85   :  { %2297 = vmatprep.subr.bf16.mxu1 %v2296_v61  ;;  %v260_v61 = vld [vmem:[#allocation5 + $0x520] sm:$0xff]  ;;  %v2316_v1 = vpack.c.bf16 %v245_v56, %v244_v55  ;;  %v230_v14 = vld [vmem:[#allocation5 + $0x430] sm:$0xff]  ;;  %v283_v40 = vld [vmem:[#allocation5 + $0x5d8] sm:$0xff] }
  0x86   :  { %2267 = vmatpush3.bf16.msra.mxu0 %v2266_v6  ;;  %v2615_v4 = vld [vmem:[#allocation2 + $0x10] ss:$48 sps:$4 sm:$0xff]   ;;  %v279_v6 = vld [vmem:[#allocation5 + $0x5b8] sm:$0xff]  ;;  %v2619_v10 = vld [vmem:[#allocation2 + $0x14] ss:$48 sps:$4 sm:$0xff]   ;;  %v2350_v12 = vpack.c.bf16 %v261_v62, %v260_v61  ;;  %v2322_v28 = vpack.c.bf16 %v231_v15, %v230_v14 }
  0x87   :  { %2269 = vmatprep.subr.bf16.mxu0 %v2268_v9  ;;  %v2617_v7 = vld [vmem:[#allocation2 + $0x70] ss:$48 sps:$4 sm:$0xff]   ;;  %v2879_v9 = vrot.slane %v2615_v4, %v2852_v21  ;;  %v2620_v11 = vld [vmem:[#allocation2 + $0x74] ss:$48 sps:$4 sm:$0xff]   ;;  %v2352_v18 = vpack.c.bf16 %v279_v6, %v278_v5  ;;  %v2885_v23 = vrot.slane %v2619_v10, %v2852_v21  ;;  %v253_v50 = vld [vmem:[#allocation5 + $0x4e8] sm:$0xff] }
  0x88   :  { %2299 = vmatpush3.bf16.msra.mxu1 %v2298_v8  ;;  %v2318_v8 = vpack.c.bf16 %v229_v57, %v228_v52  ;;  %v262_v16 = vld [vmem:[#allocation5 + $0x530] sm:$0xff]  ;;  %v2882_v17 = vrot.slane %v2617_v7, %v2852_v21  ;;  %v2888_v24 = vrot.slane %v2620_v11, %v2852_v21  ;;  %v280_v25 = vld [vmem:[#allocation5 + $0x5c0] sm:$0xff]  ;;  %v237_v57 = vld [vmem:[#allocation5 + $0x468] sm:$0xff] }
  0x89   :  { %2301 = vmatprep.subr.bf16.mxu1 %v2300_v13  ;;  %v2320_v13 = vpack.c.bf16 %v247_v2, %v246_v63  ;;  %v250_v37 = vld [vmem:[#allocation5 + $0x4d0] sm:$0xff]  ;;  %v252_v49 = vld [vmem:[#allocation5 + $0x4e0] sm:$0xff]  ;;  %v255_v62 = vld [vmem:[#allocation5 + $0x4f8] sm:$0xff] }
  0x8a   :  { %2271 = vmatpush3.bf16.msra.mxu0 %v2270_v19  ;;  %v263_v19 = vld [vmem:[#allocation5 + $0x538] sm:$0xff]  ;;  %v616_v27 = vcombine.high %v2879_v9, %v2882_v17  ;;  %v618_v29 = vcombine.high %v2885_v23, %v2888_v24  ;;  %v282_v39 = vld [vmem:[#allocation5 + $0x5d0] sm:$0xff]  ;;  %v284_v51 = vld [vmem:[#allocation5 + $0x5e0] sm:$0xff]  ;;  %v2332_v56 = vpack.c.bf16 %v253_v50, %v252_v49 }
  0x8b   :  { %2273 = vmatprep.subr.bf16.mxu0 %v2272_v22  ;;  %v249_v22 = vld [vmem:[#allocation5 + $0x4c8] sm:$0xff]  ;;  %v2354_v30 = vpack.c.bf16 %v263_v19, %v262_v16  ;;  %v234_v44 = vld [vmem:[#allocation5 + $0x450] sm:$0xff]  ;;  %v236_v52 = vld [vmem:[#allocation5 + $0x460] sm:$0xff] }
  0x8c   :  { %2303 = vmatpush3.bf16.msra.mxu1 %v2302_v20  ;;  %v248_v20 = vld [vmem:[#allocation5 + $0x4c0] sm:$0xff]  ;;  %v254_v61 = vld [vmem:[#allocation5 + $0x4f0] sm:$0xff]  ;;  %v239_v5 = vld [vmem:[#allocation5 + $0x478] sm:$0xff] }
  0x8d   :  { %2305 = vmatprep.subr.bf16.mxu1 %v2304_v26  ;;  %v281_v26 = vld [vmem:[#allocation5 + $0x5c8] sm:$0xff]  ;;  %v2324_v31 = vpack.c.bf16 %v249_v22, %v248_v20  ;;  %v268_v58 = vld [vmem:[#allocation5 + $0x560] sm:$0xff]  ;;  %v286_v63 = vld [vmem:[#allocation5 + $0x5f0] sm:$0xff] }
  0x8e   :  { %2275 = vmatpush3.bf16.msra.mxu0 %v2274_v32  ;;  %v232_v32 = vld [vmem:[#allocation5 + $0x440] sm:$0xff]  ;;  %v2356_v35 = vpack.c.bf16 %v281_v26, %v280_v25  ;;  %v238_v4 = vld [vmem:[#allocation5 + $0x470] sm:$0xff]  ;;  %v305_v11 = vld [vmem:[#allocation5 + $0x688] sm:$0xff] }
  0x8f   :  { %2309 = vmatprep.subr.bf16.mxu0 %v2308_v34  ;;  %v264_v34 = vld [vmem:[#allocation5 + $0x540] sm:$0xff]  ;;  %v270_v6 = vld [vmem:[#allocation5 + $0x570] sm:$0xff]  ;;  %v337_v15 = vld [vmem:[#allocation5 + $0x788] sm:$0xff]  ;;  %v2338_v16 = vpack.c.bf16 %v239_v5, %v238_v4 }
  0x90   :  { %2307 = vmatpush3.bf16.msra.mxu1 %v2306_v33  ;;  %v233_v33 = vld [vmem:[#allocation5 + $0x448] sm:$0xff]  ;;  %v304_v10 = vld [vmem:[#allocation5 + $0x680] sm:$0xff]  ;;  %v306_v20 = vld [vmem:[#allocation5 + $0x690] sm:$0xff] }
  0x91   :  { %2341 = vmatprep.subr.bf16.mxu1 %v2340_v38  ;;  %956 = vmatmul.mubr.f32.vlgmr.msra.gmra.mrb[2].mxu0 %v579_v42  ;;  %v251_v38 = vld [vmem:[#allocation5 + $0x4d8] sm:$0xff]  ;;  %v2326_v41 = vpack.c.bf16 %v233_v33, %v232_v32  ;;  %v2358_v42 = vpack.c.bf16 %v265_v36, %v264_v34  ;;  %v336_v14 = vld [vmem:[#allocation5 + $0x780] sm:$0xff]  ;;  %v321_v19 = vld [vmem:[#allocation5 + $0x708] sm:$0xff]  ;;  %v2372_v25 = vpack.c.bf16 %v305_v11, %v304_v10 }
  0x92   :  { %2311 = vmatpush3.bf16.msra.mxu0 %v2310_v45  ;;  %1095 = vmatprep.mubr.f32.mxu0 %v616_v27  ;;  %v2328_v43 = vpack.c.bf16 %v251_v38, %v250_v37  ;;  %v235_v45 = vld [vmem:[#allocation5 + $0x458] sm:$0xff]  ;;  %v2404_v27 = vpack.c.bf16 %v337_v15, %v336_v14  ;;  %v617_v34 = vcombine.low %v2885_v23, %v2888_v24  ;;  %v309_v23 = vld [vmem:[#allocation5 + $0x6a8] sm:$0xff]  ;;  %v296_v14 = vld [vmem:[#allocation5 + $0x640] sm:$0xff] }
  0x93   :  { %1026 = vmatmul.mubr.f32.vlgmr.msra.gmra.mrb[2].mxu1 %v581_v46  ;;  %2313 = vmatprep.subr.bf16.mxu0 %v2312_v48  ;;  %v266_v46 = vld [vmem:[#allocation5 + $0x550] sm:$0xff]  ;;  %v267_v48 = vld [vmem:[#allocation5 + $0x558] sm:$0xff]  ;;  %v2330_v54 = vpack.c.bf16 %v235_v45, %v234_v44  ;;  %v308_v44 = vld [vmem:[#allocation5 + $0x6a0] sm:$0xff] }
  0x94   :  { %2343 = vmatpush3.bf16.msra.mxu1 %v2342_v47  ;;  %1165 = vmatprep.mubr.f32.mxu1 %v618_v29  ;;  %v2360_v47 = vpack.c.bf16 %v283_v40, %v282_v39  ;;  %v2362_v55 = vpack.c.bf16 %v267_v48, %v266_v46  ;;  %v307_v26 = vld [vmem:[#allocation5 + $0x698] sm:$0xff]  ;;  %v615_v29 = vcombine.low %v2879_v9, %v2882_v17  ;;  %v290_v40 = vld [vmem:[#allocation5 + $0x610] sm:$0xff]  ;;  %v340_v46 = vld [vmem:[#allocation5 + $0x7a0] sm:$0xff] }
  0x95   :  { %2345 = vmatprep.subr.bf16.mxu1 %v2344_v53  ;;  %v285_v53 = vld [vmem:[#allocation5 + $0x5e8] sm:$0xff]  ;;  %v2376_v39 = vpack.c.bf16 %v307_v26, %v306_v20  ;;  %v322_v9 = vld [vmem:[#allocation5 + $0x710] sm:$0xff]  ;;  %v327_v5 = vld [vmem:[#allocation5 + $0x738] sm:$0xff] }
  0x96   :  { %2315 = vmatpush3.bf16.msra.mxu0 %v2314_v60  ;;  %v2364_v59 = vpack.c.bf16 %v285_v53, %v284_v51  ;;  %v269_v60 = vld [vmem:[#allocation5 + $0x568] sm:$0xff]  ;;  %v2380_v53 = vpack.c.bf16 %v309_v23, %v308_v44  ;;  %v314_v20 = vld [vmem:[#allocation5 + $0x6d0] sm:$0xff]  ;;  %v347_v26 = vld [vmem:[#allocation5 + $0x7d8] sm:$0xff] }
  0x97   :  { %2317 = vmatprep.subr.bf16.mxu0 %v2316_v1  ;;  %v2334_v1 = vpack.c.bf16 %v237_v57, %v236_v52  ;;  %v2366_v2 = vpack.c.bf16 %v269_v60, %v268_v58  ;;  %v2623_v32 = vld [vmem:[#allocation2 + $0x78] ss:$48 sps:$4 sm:$0xff]   ;;  %v2625_v36 = vld [vmem:[#allocation2 + $0x1c] ss:$48 sps:$4 sm:$0xff]   ;;  %v310_v58 = vld [vmem:[#allocation5 + $0x6b0] sm:$0xff] }
  0x98   :  { %2347 = vmatpush3.bf16.msra.mxu1 %v2346_v0  ;;  %v287_v0 = vld [vmem:[#allocation5 + $0x5f8] sm:$0xff]  ;;  %v2902_v17 = vrot.slane %v2623_v32, %v2852_v21  ;;  %v2905_v24 = vrot.slane %v2625_v36, %v2852_v21  ;;  %v325_v57 = vld [vmem:[#allocation5 + $0x728] sm:$0xff]  ;;  %v342_v60 = vld [vmem:[#allocation5 + $0x7b0] sm:$0xff] }
  0x99   :  { %2349 = vmatprep.subr.bf16.mxu1 %v2348_v3  ;;  %v2336_v3 = vpack.c.bf16 %v255_v62, %v254_v61  ;;  %v2368_v7 = vpack.c.bf16 %v287_v0, %v286_v63  ;;  %v2626_v37 = vld [vmem:[#allocation2 + $0x7c] ss:$48 sps:$4 sm:$0xff]   ;;  %v330_v32 = vld [vmem:[#allocation5 + $0x750] sm:$0xff]  ;;  %v316_v36 = vld [vmem:[#allocation5 + $0x6e0] sm:$0xff] }
  0x9a   :  { %2319 = vmatpush3.bf16.msra.mxu0 %v2318_v8  ;;  %v271_v8 = vld [vmem:[#allocation5 + $0x578] sm:$0xff]  ;;  %v2908_v45 = vrot.slane %v2626_v37, %v2852_v21  ;;  %v345_v10 = vld [vmem:[#allocation5 + $0x7c8] sm:$0xff] }
  0x9b   :  { %2321 = vmatprep.subr.bf16.mxu0 %v2320_v13  ;;  %v289_v13 = vld [vmem:[#allocation5 + $0x608] sm:$0xff]  ;;  %v2370_v22 = vpack.c.bf16 %v271_v8, %v270_v6  ;;  %v343_v61 = vld [vmem:[#allocation5 + $0x7b8] sm:$0xff]  ;;  %v312_v6 = vld [vmem:[#allocation5 + $0x6c0] sm:$0xff] }
  0x9c   :  { %2351 = vmatpush3.bf16.msra.mxu1 %v2350_v12  ;;  %v288_v12 = vld [vmem:[#allocation5 + $0x600] sm:$0xff]  ;;  %v654_v50 = vcombine.high %v2905_v24, %v2908_v45  ;;  %v2416_v4 = vpack.c.bf16 %v343_v61, %v342_v60  ;;  %v297_v15 = vld [vmem:[#allocation5 + $0x648] sm:$0xff] }
  0x9d   :  { %2353 = vmatprep.subr.bf16.mxu1 %v2352_v18  ;;  %v320_v18 = vld [vmem:[#allocation5 + $0x700] sm:$0xff]  ;;  %v2374_v33 = vpack.c.bf16 %v289_v13, %v288_v12  ;;  %v317_v37 = vld [vmem:[#allocation5 + $0x6e8] sm:$0xff] }
  0x9e   :  { %2323 = vmatpush3.bf16.msra.mxu0 %v2322_v28  ;;  %v2621_v28 = vld [vmem:[#allocation2 + $0x18] ss:$48 sps:$4 sm:$0xff]   ;;  %v2406_v38 = vpack.c.bf16 %v321_v19, %v320_v18  ;;  %v344_v8 = vld [vmem:[#allocation5 + $0x7c0] sm:$0xff]  ;;  %v2396_v23 = vpack.c.bf16 %v317_v37, %v316_v36 }
  0x9f   :  { %2325 = vmatprep.subr.bf16.mxu0 %v2324_v31  ;;  %v339_v31 = vld [vmem:[#allocation5 + $0x798] sm:$0xff]  ;;  %v2420_v18 = vpack.c.bf16 %v345_v10, %v344_v8  ;;  %v329_v19 = vld [vmem:[#allocation5 + $0x748] sm:$0xff]  ;;  %v400_v61 = vld [vmem:[#allocation5 + $0x980] sm:$0xff] }
  0xa0   :  { %2355 = vmatpush3.bf16.msra.mxu1 %v2354_v30  ;;  %v338_v30 = vld [vmem:[#allocation5 + $0x790] sm:$0xff]  ;;  %v384_v8 = vld [vmem:[#allocation5 + $0x900] sm:$0xff]  ;;  %v405_v37 = vld [vmem:[#allocation5 + $0x9a8] sm:$0xff] }
  0xa1   :  { %2357 = vmatprep.subr.bf16.mxu1 %v2356_v35  ;;  %v2899_v35 = vrot.slane %v2621_v28, %v2852_v21  ;;  %v404_v36 = vld [vmem:[#allocation5 + $0x9a0] sm:$0xff] }
  0xa2   :  { %2327 = vmatpush3.bf16.msra.mxu0 %v2326_v41  ;;  %v291_v41 = vld [vmem:[#allocation5 + $0x618] sm:$0xff] }
  0xa3   :  { %2329 = vmatprep.subr.bf16.mxu0 %v2328_v43  ;;  %v323_v43 = vld [vmem:[#allocation5 + $0x718] sm:$0xff]  ;;  %v652_v48 = vcombine.high %v2899_v35, %v2902_v17  ;;  %v2378_v49 = vpack.c.bf16 %v291_v41, %v290_v40  ;;  %v349_v40 = vld [vmem:[#allocation5 + $0x7e8] sm:$0xff] }
  0xa4   :  { %2359 = vmatpush3.bf16.msra.mxu1 %v2358_v42  ;;  %v2408_v42 = vpack.c.bf16 %v339_v31, %v338_v30  ;;  %v2410_v51 = vpack.c.bf16 %v323_v43, %v322_v9  ;;  %v298_v30 = vld [vmem:[#allocation5 + $0x650] sm:$0xff]  ;;  %v299_v31 = vld [vmem:[#allocation5 + $0x658] sm:$0xff]  ;;  %v301_v9 = vld [vmem:[#allocation5 + $0x668] sm:$0xff] }
  0xa5   :  { %2361 = vmatprep.subr.bf16.mxu1 %v2360_v47  ;;  %v341_v47 = vld [vmem:[#allocation5 + $0x7a8] sm:$0xff]  ;;  %v2394_v41 = vpack.c.bf16 %v299_v31, %v298_v30  ;;  %v355_v30 = vld [vmem:[#allocation5 + $0x818] sm:$0xff] }
  0xa6   :  { %2331 = vmatpush3.bf16.msra.mxu0 %v2330_v54  ;;  %v292_v54 = vld [vmem:[#allocation5 + $0x620] sm:$0xff]  ;;  %v2412_v52 = vpack.c.bf16 %v341_v47, %v340_v46  ;;  %v333_v43 = vld [vmem:[#allocation5 + $0x768] sm:$0xff]  ;;  %v318_v46 = vld [vmem:[#allocation5 + $0x6f0] sm:$0xff] }
  0xa7   :  { %2333 = vmatprep.subr.bf16.mxu0 %v2332_v56  ;;  %v324_v56 = vld [vmem:[#allocation5 + $0x720] sm:$0xff]  ;;  %v387_v31 = vld [vmem:[#allocation5 + $0x918] sm:$0xff] }
  0xa8   :  { %2363 = vmatpush3.bf16.msra.mxu1 %v2362_v55  ;;  %v293_v55 = vld [vmem:[#allocation5 + $0x628] sm:$0xff]  ;;  %v2414_v63 = vpack.c.bf16 %v325_v57, %v324_v56  ;;  %v335_v57 = vld [vmem:[#allocation5 + $0x778] sm:$0xff] }
  0xa9   :  { %2365 = vmatprep.subr.bf16.mxu1 %v2364_v59  ;;  %v311_v59 = vld [vmem:[#allocation5 + $0x6b8] sm:$0xff]  ;;  %v2382_v62 = vpack.c.bf16 %v293_v55, %v292_v54  ;;  %v334_v55 = vld [vmem:[#allocation5 + $0x770] sm:$0xff] }
  0xaa   :  { %2335 = vmatpush3.bf16.msra.mxu0 %v2334_v1  ;;  %v2384_v0 = vpack.c.bf16 %v311_v59, %v310_v58  ;;  %v294_v1 = vld [vmem:[#allocation5 + $0x630] sm:$0xff]  ;;  %v303_v54 = vld [vmem:[#allocation5 + $0x678] sm:$0xff]  ;;  %v368_v58 = vld [vmem:[#allocation5 + $0x880] sm:$0xff] }
  0xab   :  { %2337 = vmatprep.subr.bf16.mxu0 %v2336_v3  ;;  %v326_v3 = vld [vmem:[#allocation5 + $0x730] sm:$0xff]  ;;  %v369_v59 = vld [vmem:[#allocation5 + $0x888] sm:$0xff] }
  0xac   :  { %2367 = vmatpush3.bf16.msra.mxu1 %v2366_v2  ;;  %v295_v2 = vld [vmem:[#allocation5 + $0x638] sm:$0xff]  ;;  %v2418_v12 = vpack.c.bf16 %v327_v5, %v326_v3  ;;  %v2436_v5 = vpack.c.bf16 %v369_v59, %v368_v58  ;;  %v360_v58 = vld [vmem:[#allocation5 + $0x840] sm:$0xff] }
  0xad   :  { %2369 = vmatprep.subr.bf16.mxu1 %v2368_v7  ;;  %v313_v7 = vld [vmem:[#allocation5 + $0x6c8] sm:$0xff]  ;;  %v2386_v11 = vpack.c.bf16 %v295_v2, %v294_v1  ;;  %v2631_v1 = vld [vmem:[#allocation2 + $0x24] ss:$48 sps:$4 sm:$0xff]  }
  0xae   :  { %2339 = vmatpush3.bf16.msra.mxu0 %v2338_v16  ;;  %v2388_v13 = vpack.c.bf16 %v313_v7, %v312_v6  ;;  %v328_v16 = vld [vmem:[#allocation5 + $0x740] sm:$0xff]  ;;  %v353_v7 = vld [vmem:[#allocation5 + $0x808] sm:$0xff] }
  0xaf   :  { %2373 = vmatprep.subr.bf16.mxu0 %v2372_v25  ;;  %v346_v25 = vld [vmem:[#allocation5 + $0x7d0] sm:$0xff]  ;;  %v2422_v28 = vpack.c.bf16 %v329_v19, %v328_v16  ;;  %v352_v6 = vld [vmem:[#allocation5 + $0x800] sm:$0xff]  ;;  %v651_v16 = vcombine.low %v2899_v35, %v2902_v17  ;;  %v403_v19 = vld [vmem:[#allocation5 + $0x998] sm:$0xff] }
  0xb0   :  { %2371 = vmatpush3.bf16.msra.mxu1 %v2370_v22  ;;  %v315_v22 = vld [vmem:[#allocation5 + $0x6d8] sm:$0xff]  ;;  %v2632_v2 = vld [vmem:[#allocation2 + $0x84] ss:$48 sps:$4 sm:$0xff]  }
  0xb1   :  { %2405 = vmatprep.subr.bf16.mxu1 %v2404_v27  ;;  %1096 = vmatmul.mubr.f32.vlgmr.msra.gmra.mrb[4].mxu0 %v615_v29  ;;  %v2390_v27 = vpack.c.bf16 %v297_v15, %v296_v14  ;;  %v2392_v29 = vpack.c.bf16 %v315_v22, %v314_v20  ;;  %v2923_v20 = vrot.slane %v2631_v1, %v2852_v21  ;;  %v386_v35 = vld [vmem:[#allocation5 + $0x910] sm:$0xff]  ;;  %v408_v59 = vld [vmem:[#allocation5 + $0x9c0] sm:$0xff] }
  0xb2   :  { %2375 = vmatpush3.bf16.msra.mxu0 %v2374_v33  ;;  %1235 = vmatprep.mubr.f32.mxu0 %v652_v48  ;;  %v2424_v33 = vpack.c.bf16 %v347_v26, %v346_v25  ;;  %v319_v48 = vld [vmem:[#allocation5 + $0x6f8] sm:$0xff]  ;;  %v2926_v22 = vrot.slane %v2632_v2, %v2852_v21  ;;  %v2438_v25 = vpack.c.bf16 %v353_v7, %v352_v6  ;;  %v410_v6 = vld [vmem:[#allocation5 + $0x9d0] sm:$0xff] }
  0xb3   :  { %1166 = vmatmul.mubr.f32.vlgmr.msra.gmra.mrb[4].mxu1 %v617_v34  ;;  %2377 = vmatprep.subr.bf16.mxu0 %v2376_v39  ;;  %v331_v34 = vld [vmem:[#allocation5 + $0x758] sm:$0xff]  ;;  %v348_v39 = vld [vmem:[#allocation5 + $0x7e0] sm:$0xff]  ;;  %v653_v26 = vcombine.low %v2905_v24, %v2908_v45 }
  0xb4   :  { %2407 = vmatpush3.bf16.msra.mxu1 %v2406_v38  ;;  %1305 = vmatprep.mubr.f32.mxu1 %v654_v50  ;;  %v300_v38 = vld [vmem:[#allocation5 + $0x660] sm:$0xff]  ;;  %v2426_v44 = vpack.c.bf16 %v331_v34, %v330_v32  ;;  %v2428_v47 = vpack.c.bf16 %v349_v40, %v348_v39  ;;  %v351_v50 = vld [vmem:[#allocation5 + $0x7f8] sm:$0xff]  ;;  %v690_v24 = vcombine.high %v2923_v20, %v2926_v22 }
  0xb5   :  { %2409 = vmatprep.subr.bf16.mxu1 %v2408_v42  ;;  %v332_v42 = vld [vmem:[#allocation5 + $0x760] sm:$0xff]  ;;  %v411_v7 = vld [vmem:[#allocation5 + $0x9d8] sm:$0xff] }
  0xb6   :  { %2379 = vmatpush3.bf16.msra.mxu0 %v2378_v49  ;;  %v350_v49 = vld [vmem:[#allocation5 + $0x7f0] sm:$0xff]  ;;  %v2430_v56 = vpack.c.bf16 %v333_v43, %v332_v42  ;;  %v372_v32 = vld [vmem:[#allocation5 + $0x8a0] sm:$0xff]  ;;  %v2476_v42 = vpack.c.bf16 %v405_v37, %v404_v36  ;;  %v389_v43 = vld [vmem:[#allocation5 + $0x928] sm:$0xff] }
  0xb7   :  { %2381 = vmatprep.subr.bf16.mxu0 %v2380_v53  ;;  %v302_v53 = vld [vmem:[#allocation5 + $0x670] sm:$0xff]  ;;  %v2432_v60 = vpack.c.bf16 %v351_v50, %v350_v49  ;;  %v356_v40 = vld [vmem:[#allocation5 + $0x820] sm:$0xff]  ;;  %v383_v37 = vld [vmem:[#allocation5 + $0x8f8] sm:$0xff] }
  0xb8   :  { %2411 = vmatpush3.bf16.msra.mxu1 %v2410_v51  ;;  %v2398_v51 = vpack.c.bf16 %v301_v9, %v300_v38  ;;  %v2402_v3 = vpack.c.bf16 %v303_v54, %v302_v53  ;;  %v2474_v38 = vpack.c.bf16 %v387_v31, %v386_v35  ;;  %v388_v9 = vld [vmem:[#allocation5 + $0x920] sm:$0xff]  ;;  %v359_v53 = vld [vmem:[#allocation5 + $0x838] sm:$0xff]  ;;  %v390_v54 = vld [vmem:[#allocation5 + $0x930] sm:$0xff] }
  0xb9   :  { %2413 = vmatprep.subr.bf16.mxu1 %v2412_v52  ;;  %v2400_v52 = vpack.c.bf16 %v319_v48, %v318_v46  ;;  %v406_v46 = vld [vmem:[#allocation5 + $0x9b0] sm:$0xff]  ;;  %v2478_v49 = vpack.c.bf16 %v389_v43, %v388_v9  ;;  %v365_v31 = vld [vmem:[#allocation5 + $0x868] sm:$0xff]  ;;  %v399_v43 = vld [vmem:[#allocation5 + $0x978] sm:$0xff] }
  0xba   :  { %2383 = vmatpush3.bf16.msra.mxu0 %v2382_v62  ;;  %v2627_v62 = vld [vmem:[#allocation2 + $0x20] ss:$48 sps:$4 sm:$0xff]  }
  0xbb   :  { %2385 = vmatprep.subr.bf16.mxu0 %v2384_v0  ;;  %v401_v0 = vld [vmem:[#allocation5 + $0x988] sm:$0xff]  ;;  %v2915_v14 = vrot.slane %v2627_v62, %v2852_v21  ;;  %v382_v36 = vld [vmem:[#allocation5 + $0x8f0] sm:$0xff] }
  0xbc   :  { %2415 = vmatpush3.bf16.msra.mxu1 %v2414_v63  ;;  %v2629_v63 = vld [vmem:[#allocation2 + $0x80] ss:$48 sps:$4 sm:$0xff]   ;;  %v2468_v10 = vpack.c.bf16 %v401_v0, %v400_v61  ;;  %v361_v62 = vld [vmem:[#allocation5 + $0x848] sm:$0xff] }
  0xbd   :  { %2417 = vmatprep.subr.bf16.mxu1 %v2416_v4  ;;  %v2434_v4 = vpack.c.bf16 %v335_v57, %v334_v55  ;;  %v2918_v15 = vrot.slane %v2629_v63, %v2852_v21  ;;  %v377_v57 = vld [vmem:[#allocation5 + $0x8c8] sm:$0xff]  ;;  %v392_v63 = vld [vmem:[#allocation5 + $0x940] sm:$0xff] }
  0xbe   :  { %2387 = vmatpush3.bf16.msra.mxu0 %v2386_v11  ;;  %v385_v11 = vld [vmem:[#allocation5 + $0x908] sm:$0xff] }
  0xbf   :  { %2389 = vmatprep.subr.bf16.mxu0 %v2388_v13  ;;  %v371_v13 = vld [vmem:[#allocation5 + $0x898] sm:$0xff]  ;;  %v688_v34 = vcombine.high %v2915_v14, %v2918_v15  ;;  %v393_v0 = vld [vmem:[#allocation5 + $0x948] sm:$0xff] }
  0xc0   :  { %2419 = vmatpush3.bf16.msra.mxu1 %v2418_v12  ;;  %v370_v12 = vld [vmem:[#allocation5 + $0x890] sm:$0xff] }
  0xc1   :  { %2421 = vmatprep.subr.bf16.mxu1 %v2420_v18  ;;  %v402_v18 = vld [vmem:[#allocation5 + $0x990] sm:$0xff] }
  0xc2   :  { %2391 = vmatpush3.bf16.msra.mxu0 %v2390_v27  ;;  %v2470_v27 = vpack.c.bf16 %v385_v11, %v384_v8  ;;  %v2472_v17 = vpack.c.bf16 %v403_v19, %v402_v18  ;;  %v2454_v8 = vpack.c.bf16 %v361_v62, %v360_v58  ;;  %v2488_v18 = vpack.c.bf16 %v411_v7, %v410_v6  ;;  %v395_v19 = vld [vmem:[#allocation5 + $0x958] sm:$0xff]  ;;  %v448_v58 = vld [vmem:[#allocation5 + $0xb00] sm:$0xff] }
  0xc3   :  { %2393 = vmatprep.subr.bf16.mxu0 %v2392_v29  ;;  %v354_v29 = vld [vmem:[#allocation5 + $0x810] sm:$0xff]  ;;  %v435_v62 = vld [vmem:[#allocation5 + $0xa98] sm:$0xff]  ;;  %v689_v7 = vcombine.low %v2923_v20, %v2926_v22 }
  0xc4   :  { %2423 = vmatpush3.bf16.msra.mxu1 %v2422_v28  ;;  %v2440_v28 = vpack.c.bf16 %v371_v13, %v370_v12  ;;  %v2442_v45 = vpack.c.bf16 %v355_v30, %v354_v29  ;;  %v362_v12 = vld [vmem:[#allocation5 + $0x850] sm:$0xff]  ;;  %v363_v13 = vld [vmem:[#allocation5 + $0x858] sm:$0xff] }
  0xc5   :  { %2425 = vmatprep.subr.bf16.mxu1 %v2424_v33  ;;  %v373_v33 = vld [vmem:[#allocation5 + $0x8a8] sm:$0xff]  ;;  %v2458_v29 = vpack.c.bf16 %v363_v13, %v362_v12  ;;  %v419_v12 = vld [vmem:[#allocation5 + $0xa18] sm:$0xff] }
  0xc6   :  { %2395 = vmatpush3.bf16.msra.mxu0 %v2394_v41  ;;  %v2444_v39 = vpack.c.bf16 %v373_v33, %v372_v32  ;;  %v357_v41 = vld [vmem:[#allocation5 + $0x828] sm:$0xff]  ;;  %v396_v32 = vld [vmem:[#allocation5 + $0x960] sm:$0xff]  ;;  %v451_v13 = vld [vmem:[#allocation5 + $0xb18] sm:$0xff] }
  0xc7   :  { %2397 = vmatprep.subr.bf16.mxu0 %v2396_v23  ;;  %v375_v23 = vld [vmem:[#allocation5 + $0x8b8] sm:$0xff]  ;;  %v2446_v48 = vpack.c.bf16 %v357_v41, %v356_v40  ;;  %v398_v41 = vld [vmem:[#allocation5 + $0x970] sm:$0xff] }
  0xc8   :  { %2427 = vmatpush3.bf16.msra.mxu1 %v2426_v44  ;;  %v374_v44 = vld [vmem:[#allocation5 + $0x8b0] sm:$0xff]  ;;  %v367_v40 = vld [vmem:[#allocation5 + $0x878] sm:$0xff] }
  0xc9   :  { %2429 = vmatprep.subr.bf16.mxu1 %v2428_v47  ;;  %v407_v47 = vld [vmem:[#allocation5 + $0x9b8] sm:$0xff]  ;;  %v2448_v50 = vpack.c.bf16 %v375_v23, %v374_v44  ;;  %v432_v44 = vld [vmem:[#allocation5 + $0xa80] sm:$0xff]  ;;  %v433_v23 = vld [vmem:[#allocation5 + $0xa88] sm:$0xff] }
  0xca   :  { %2399 = vmatpush3.bf16.msra.mxu0 %v2398_v51  ;;  %v358_v51 = vld [vmem:[#allocation5 + $0x830] sm:$0xff]  ;;  %v2480_v55 = vpack.c.bf16 %v407_v47, %v406_v46  ;;  %v464_v47 = vld [vmem:[#allocation5 + $0xb80] sm:$0xff] }
  0xcb   :  { %2401 = vmatprep.subr.bf16.mxu0 %v2400_v52  ;;  %v376_v52 = vld [vmem:[#allocation5 + $0x8c0] sm:$0xff]  ;;  %v2450_v61 = vpack.c.bf16 %v359_v53, %v358_v51  ;;  %v2637_v51 = vld [vmem:[#allocation2 + $0x2c] ss:$48 sps:$4 sm:$0xff]  }
  0xcc   :  { %2431 = vmatpush3.bf16.msra.mxu1 %v2430_v56  ;;  %v391_v56 = vld [vmem:[#allocation5 + $0x938] sm:$0xff]  ;;  %v2452_v2 = vpack.c.bf16 %v377_v57, %v376_v52  ;;  %v416_v52 = vld [vmem:[#allocation5 + $0xa00] sm:$0xff]  ;;  %v417_v57 = vld [vmem:[#allocation5 + $0xa08] sm:$0xff] }
  0xcd   :  { %2433 = vmatprep.subr.bf16.mxu1 %v2432_v60  ;;  %v409_v60 = vld [vmem:[#allocation5 + $0x9c8] sm:$0xff]  ;;  %v2482_v1 = vpack.c.bf16 %v391_v56, %v390_v54  ;;  %v2500_v56 = vpack.c.bf16 %v433_v23, %v432_v44  ;;  %v2502_v6 = vpack.c.bf16 %v417_v57, %v416_v52  ;;  %v475_v52 = vld [vmem:[#allocation5 + $0xbd8] sm:$0xff] }
  0xce   :  { %2403 = vmatpush3.bf16.msra.mxu0 %v2402_v3  ;;  %v378_v3 = vld [vmem:[#allocation5 + $0x8d0] sm:$0xff]  ;;  %v2638_v53 = vld [vmem:[#allocation2 + $0x8c] ss:$48 sps:$4 sm:$0xff]  }
  0xcf   :  { %2437 = vmatprep.subr.bf16.mxu0 %v2436_v5  ;;  %v379_v5 = vld [vmem:[#allocation5 + $0x8d8] sm:$0xff]  ;;  %v473_v44 = vld [vmem:[#allocation5 + $0xbc8] sm:$0xff] }
  0xd0   :  { %2435 = vmatpush3.bf16.msra.mxu1 %v2434_v4  ;;  %v2484_v4 = vpack.c.bf16 %v409_v60, %v408_v59  ;;  %v2456_v11 = vpack.c.bf16 %v379_v5, %v378_v3  ;;  %v449_v60 = vld [vmem:[#allocation5 + $0xb08] sm:$0xff]  ;;  %v467_v3 = vld [vmem:[#allocation5 + $0xb98] sm:$0xff]  ;;  %v2946_v5 = vrot.slane %v2638_v53, %v2852_v21 }
  0xd1   :  { %2469 = vmatprep.subr.bf16.mxu1 %v2468_v10  ;;  %1236 = vmatmul.mubr.f32.vlgmr.msra.gmra.mrb[6].mxu0 %v651_v16  ;;  %v2486_v10 = vpack.c.bf16 %v393_v0, %v392_v63  ;;  %v394_v16 = vld [vmem:[#allocation5 + $0x950] sm:$0xff]  ;;  %v457_v53 = vld [vmem:[#allocation5 + $0xb48] sm:$0xff] }
  0xd2   :  { %2439 = vmatpush3.bf16.msra.mxu0 %v2438_v25  ;;  %1375 = vmatprep.mubr.f32.mxu0 %v688_v34  ;;  %v380_v25 = vld [vmem:[#allocation5 + $0x8e0] sm:$0xff]  ;;  %v2490_v30 = vpack.c.bf16 %v395_v19, %v394_v16  ;;  %v397_v34 = vld [vmem:[#allocation5 + $0x968] sm:$0xff] }
  0xd3   :  { %1306 = vmatmul.mubr.f32.vlgmr.msra.gmra.mrb[6].mxu1 %v653_v26  ;;  %2441 = vmatprep.subr.bf16.mxu0 %v2440_v28  ;;  %v381_v26 = vld [vmem:[#allocation5 + $0x8e8] sm:$0xff]  ;;  %v2494_v9 = vpack.c.bf16 %v397_v34, %v396_v32  ;;  %v436_v16 = vld [vmem:[#allocation5 + $0xaa0] sm:$0xff]  ;;  %v439_v32 = vld [vmem:[#allocation5 + $0xab8] sm:$0xff] }
  0xd4   :  { %2471 = vmatpush3.bf16.msra.mxu1 %v2470_v27  ;;  %1445 = vmatprep.mubr.f32.mxu1 %v690_v24  ;;  %v412_v27 = vld [vmem:[#allocation5 + $0x9e0] sm:$0xff]  ;;  %v413_v28 = vld [vmem:[#allocation5 + $0x9e8] sm:$0xff]  ;;  %v2460_v35 = vpack.c.bf16 %v381_v26, %v380_v25  ;;  %v414_v24 = vld [vmem:[#allocation5 + $0x9f0] sm:$0xff] }
  0xd5   :  { %2473 = vmatprep.subr.bf16.mxu1 %v2472_v17  ;;  %v364_v17 = vld [vmem:[#allocation5 + $0x860] sm:$0xff]  ;;  %v2492_v33 = vpack.c.bf16 %v413_v28, %v412_v27  ;;  %v469_v25 = vld [vmem:[#allocation5 + $0xba8] sm:$0xff]  ;;  %v471_v34 = vld [vmem:[#allocation5 + $0xbb8] sm:$0xff] }
  0xd6   :  { %2443 = vmatpush3.bf16.msra.mxu0 %v2442_v45  ;;  %v415_v45 = vld [vmem:[#allocation5 + $0x9f8] sm:$0xff]  ;;  %v468_v19 = vld [vmem:[#allocation5 + $0xba0] sm:$0xff] }
  0xd7   :  { %2445 = vmatprep.subr.bf16.mxu0 %v2444_v39  ;;  %v366_v39 = vld [vmem:[#allocation5 + $0x870] sm:$0xff]  ;;  %v2496_v46 = vpack.c.bf16 %v415_v45, %v414_v24  ;;  %v420_v28 = vld [vmem:[#allocation5 + $0xa20] sm:$0xff] }
  0xd8   :  { %2475 = vmatpush3.bf16.msra.mxu1 %v2474_v38  ;;  %v2462_v38 = vpack.c.bf16 %v365_v31, %v364_v17  ;;  %v2466_v54 = vpack.c.bf16 %v367_v40, %v366_v39  ;;  %v453_v17 = vld [vmem:[#allocation5 + $0xb28] sm:$0xff]  ;;  %v438_v31 = vld [vmem:[#allocation5 + $0xab0] sm:$0xff] }
  0xd9   :  { %2477 = vmatprep.subr.bf16.mxu1 %v2476_v42  ;;  %v2464_v42 = vpack.c.bf16 %v383_v37, %v382_v36  ;;  %v2512_v24 = vpack.c.bf16 %v439_v32, %v438_v31  ;;  %v422_v45 = vld [vmem:[#allocation5 + $0xa30] sm:$0xff] }
  0xda   :  { %2447 = vmatpush3.bf16.msra.mxu0 %v2446_v48  ;;  %v2633_v48 = vld [vmem:[#allocation2 + $0x28] ss:$48 sps:$4 sm:$0xff]   ;;  %v454_v39 = vld [vmem:[#allocation5 + $0xb30] sm:$0xff] }
  0xdb   :  { %2449 = vmatprep.subr.bf16.mxu0 %v2448_v50  ;;  %v465_v50 = vld [vmem:[#allocation5 + $0xb88] sm:$0xff]  ;;  %v2935_v63 = vrot.slane %v2633_v48, %v2852_v21  ;;  %v424_v48 = vld [vmem:[#allocation5 + $0xa40] sm:$0xff] }
  0xdc   :  { %2479 = vmatpush3.bf16.msra.mxu1 %v2478_v49  ;;  %v2635_v49 = vld [vmem:[#allocation2 + $0x88] ss:$48 sps:$4 sm:$0xff]   ;;  %v2532_v59 = vpack.c.bf16 %v465_v50, %v464_v47  ;;  %v456_v50 = vld [vmem:[#allocation5 + $0xb40] sm:$0xff] }
  0xdd   :  { %2481 = vmatprep.subr.bf16.mxu1 %v2480_v55  ;;  %v2498_v55 = vpack.c.bf16 %v399_v43, %v398_v41  ;;  %v2938_v0 = vrot.slane %v2635_v49, %v2852_v21  ;;  %v455_v41 = vld [vmem:[#allocation5 + $0xb38] sm:$0xff]  ;;  %v472_v43 = vld [vmem:[#allocation5 + $0xbc0] sm:$0xff]  ;;  %v425_v49 = vld [vmem:[#allocation5 + $0xa48] sm:$0xff] }
  0xde   :  { %2451 = vmatpush3.bf16.msra.mxu0 %v2450_v61  ;;  %v434_v61 = vld [vmem:[#allocation5 + $0xa90] sm:$0xff]  ;;  %v2518_v57 = vpack.c.bf16 %v425_v49, %v424_v48  ;;  %v1599_v49 = vld [vmem:[%s3021_s3 + $0x38] sm:$0xff] }
  0xdf   :  { %2453 = vmatprep.subr.bf16.mxu0 %v2452_v2  ;;  %v466_v2 = vld [vmem:[#allocation5 + $0xb90] sm:$0xff] }
  0xe0   :  { %2483 = vmatpush3.bf16.msra.mxu1 %v2482_v1  ;;  %v687_v1 = vcombine.low %v2915_v14, %v2918_v15  ;;  %v450_v14 = vld [vmem:[#allocation5 + $0xb10] sm:$0xff]  ;;  %v2536_v15 = vpack.c.bf16 %v467_v3, %v466_v2  ;;  %v459_v2 = vld [vmem:[#allocation5 + $0xb58] sm:$0xff]  ;;  %v444_v3 = vld [vmem:[#allocation5 + $0xae0] sm:$0xff] }
  0xe1   :  { %2485 = vmatprep.subr.bf16.mxu1 %v2484_v4  ;;  %v2943_v4 = vrot.slane %v2637_v51, %v2852_v21  ;;  %v724_v21 = vcombine.high %v2935_v63, %v2938_v0  ;;  %v2538_v26 = vpack.c.bf16 %v451_v13, %v450_v14  ;;  %v2548_v51 = vpack.c.bf16 %v473_v44, %v472_v43  ;;  %v428_v14 = vld [vmem:[#allocation5 + $0xa60] sm:$0xff]  ;;  %v1595_v43 = vld [vmem:[%s3021_s3 + $0x18] sm:$0xff]  ;;  %v1598_v48 = vld [vmem:[%s3021_s3 + $0x30] sm:$0xff] }
  0xe2   :  { %2455 = vmatpush3.bf16.msra.mxu0 %v2454_v8  ;;  %v2534_v8 = vpack.c.bf16 %v449_v60, %v448_v58  ;;  %v2550_v58 = vpack.c.bf16 %v457_v53, %v456_v50  ;;  %v426_v60 = vld [vmem:[#allocation5 + $0xa50] sm:$0xff]  ;;  %v460_v13 = vld [vmem:[#allocation5 + $0xb60] sm:$0xff]  ;;  %v2574_v50 = vpack.c.bf16 %v1599_v49, %v1598_v48 }
  0xe3   :  { %2457 = vmatprep.subr.bf16.mxu0 %v2456_v11  ;;  %v418_v11 = vld [vmem:[#allocation5 + $0xa10] sm:$0xff]  ;;  %v726_v20 = vcombine.high %v2943_v4, %v2946_v5 }
  0xe4   :  { %2487 = vmatpush3.bf16.msra.mxu1 %v2486_v10  ;;  %v2504_v10 = vpack.c.bf16 %v435_v62, %v434_v61  ;;  %v2506_v22 = vpack.c.bf16 %v419_v12, %v418_v11  ;;  %v427_v61 = vld [vmem:[#allocation5 + $0xa58] sm:$0xff]  ;;  %v458_v62 = vld [vmem:[#allocation5 + $0xb50] sm:$0xff] }
  0xe5   :  { %2489 = vmatprep.subr.bf16.mxu1 %v2488_v18  ;;  %v437_v18 = vld [vmem:[#allocation5 + $0xaa8] sm:$0xff]  ;;  %v2554_v11 = vpack.c.bf16 %v459_v2, %v458_v62  ;;  %v1603_v62 = vld [vmem:[%s3021_s3 + $0x58] sm:$0xff] }
  0xe6   :  { %2459 = vmatpush3.bf16.msra.mxu0 %v2458_v29  ;;  %v2508_v27 = vpack.c.bf16 %v437_v18, %v436_v16  ;;  %v421_v29 = vld [vmem:[#allocation5 + $0xa28] sm:$0xff] }
  0xe7   :  { %2461 = vmatprep.subr.bf16.mxu0 %v2460_v35  ;;  %v2540_v35 = vpack.c.bf16 %v469_v25, %v468_v19  ;;  %v2510_v36 = vpack.c.bf16 %v421_v29, %v420_v28  ;;  %v461_v18 = vld [vmem:[#allocation5 + $0xb68] sm:$0xff]  ;;  %v447_v19 = vld [vmem:[#allocation5 + $0xaf8] sm:$0xff]  ;;  %v478_v25 = vld [vmem:[#allocation5 + $0xbf0] sm:$0xff] }
  0xe8   :  { %2491 = vmatpush3.bf16.msra.mxu1 %v2490_v30  ;;  %v452_v30 = vld [vmem:[#allocation5 + $0xb20] sm:$0xff]  ;;  %v430_v28 = vld [vmem:[#allocation5 + $0xa70] sm:$0xff]  ;;  %v431_v29 = vld [vmem:[#allocation5 + $0xa78] sm:$0xff] }
  0xe9   :  { %2493 = vmatprep.subr.bf16.mxu1 %v2492_v33  ;;  %v470_v33 = vld [vmem:[#allocation5 + $0xbb0] sm:$0xff]  ;;  %v2542_v37 = vpack.c.bf16 %v453_v17, %v452_v30  ;;  %v463_v17 = vld [vmem:[#allocation5 + $0xb78] sm:$0xff]  ;;  %v2530_v31 = vpack.c.bf16 %v431_v29, %v430_v28 }
  0xea   :  { %2463 = vmatpush3.bf16.msra.mxu0 %v2462_v38  ;;  %v423_v38 = vld [vmem:[#allocation5 + $0xa38] sm:$0xff]  ;;  %v2544_v40 = vpack.c.bf16 %v471_v34, %v470_v33  ;;  %v723_v33 = vcombine.low %v2935_v63, %v2938_v0  ;;  %v725_v34 = vcombine.low %v2943_v4, %v2946_v5  ;;  %v1592_v63 = vld [vmem:[%s3021_s3] sm:$0xff]  ;;  %v1593_v0 = vld [vmem:[%s3021_s3 + $0x8] sm:$0xff]  ;;  %v2768_v5 = vmov 0.0|0.0  }
  0xeb   :  { %2465 = vmatprep.subr.bf16.mxu0 %v2464_v42  ;;  %v441_v42 = vld [vmem:[#allocation5 + $0xac8] sm:$0xff]  ;;  %v2514_v23 = vpack.c.bf16 %v423_v38, %v422_v45  ;;  %v1594_v4 = vld [vmem:[%s3021_s3 + $0x10] sm:$0xff] }
  0xec   :  { %2495 = vmatpush3.bf16.msra.mxu1 %v2494_v9  ;;  %v440_v9 = vld [vmem:[#allocation5 + $0xac0] sm:$0xff]  ;;  %v2568_v44 = vpack.c.bf16 %v1595_v43, %v1594_v4 }
  0xed   :  { %2497 = vmatprep.subr.bf16.mxu1 %v2496_v46  ;;  %v2546_v46 = vpack.c.bf16 %v455_v41, %v454_v39  ;;  %v2516_v47 = vpack.c.bf16 %v441_v42, %v440_v9  ;;  %v2565_v42 = vpack.c.bf16 %v1593_v0, %v1592_v63 }
  0xee   :  { %2467 = vmatpush3.bf16.msra.mxu0 %v2466_v54  ;;  %v442_v54 = vld [vmem:[#allocation5 + $0xad0] sm:$0xff] }
  0xef   :  { %2501 = vmatprep.subr.bf16.mxu0 %v2500_v56  ;;  %v474_v56 = vld [vmem:[#allocation5 + $0xbd0] sm:$0xff] }
  0xf0   :  { %2499 = vmatpush3.bf16.msra.mxu1 %v2498_v55  ;;  %v443_v55 = vld [vmem:[#allocation5 + $0xad8] sm:$0xff] }
  0xf1   :  { %2533 = vmatprep.subr.bf16.mxu1 %v2532_v59  ;;  %1376 = vmatmul.mubr.f32.vlgmr.msra.gmra.mrb[8].mxu0 %v687_v1  ;;  %v2520_v59 = vpack.c.bf16 %v443_v55, %v442_v54  ;;  %v2552_v1 = vpack.c.bf16 %v475_v52, %v474_v56  ;;  %v1600_v55 = vld [vmem:[%s3021_s3 + $0x40] sm:$0xff]  ;;  %v1601_v56 = vld [vmem:[%s3021_s3 + $0x48] sm:$0xff] }
  0xf2   :  { %2503 = vmatpush3.bf16.msra.mxu0 %v2502_v6  ;;  %1515 = vmatprep.mubr.f32.mxu0 %v724_v21  ;;  %v445_v6 = vld [vmem:[#allocation5 + $0xae8] sm:$0xff]  ;;  %v446_v21 = vld [vmem:[#allocation5 + $0xaf0] sm:$0xff] }
  0xf3   :  { %1446 = vmatmul.mubr.f32.vlgmr.msra.gmra.mrb[8].mxu1 %v689_v7  ;;  %2505 = vmatprep.subr.bf16.mxu0 %v2504_v10  ;;  %v476_v7 = vld [vmem:[#allocation5 + $0xbe0] sm:$0xff]  ;;  %v2522_v10 = vpack.c.bf16 %v427_v61, %v426_v60  ;;  %v2524_v12 = vpack.c.bf16 %v445_v6, %v444_v3  ;;  %v1602_v61 = vld [vmem:[%s3021_s3 + $0x50] sm:$0xff]  ;;  %v1605_v6 = vld [vmem:[%s3021_s3 + $0x68] sm:$0xff] }
  0xf4   :  { %2535 = vmatpush3.bf16.msra.mxu1 %v2534_v8  ;;  %1585 = vmatprep.mubr.f32.mxu1 %v726_v20  ;;  %v477_v8 = vld [vmem:[#allocation5 + $0xbe8] sm:$0xff]  ;;  %v479_v20 = vld [vmem:[#allocation5 + $0xbf8] sm:$0xff]  ;;  %v2580_v2 = vpack.c.bf16 %v1603_v62, %v1602_v61  ;;  %v1604_v3 = vld [vmem:[%s3021_s3 + $0x60] sm:$0xff] }
  0xf5   :  { %2537 = vmatprep.subr.bf16.mxu1 %v2536_v15  ;;  %v429_v15 = vld [vmem:[#allocation5 + $0xa68] sm:$0xff]  ;;  %v2556_v16 = vpack.c.bf16 %v477_v8, %v476_v7  ;;  %v2560_v30 = vpack.c.bf16 %v479_v20, %v478_v25  ;;  %v2583_v7 = vpack.c.bf16 %v1605_v6, %v1604_v3  ;;  %v1606_v8 = vld [vmem:[%s3021_s3 + $0x70] sm:$0xff] }
  0xf6   :  { %2507 = vmatpush3.bf16.msra.mxu0 %v2506_v22  ;;  %v2526_v22 = vpack.c.bf16 %v429_v15, %v428_v14 }
  0xf7   :  { %2509 = vmatprep.subr.bf16.mxu0 %v2508_v27  ;;  %v2528_v27 = vpack.c.bf16 %v447_v19, %v446_v21 }
  0xf8   :  { %2539 = vmatpush3.bf16.msra.mxu1 %v2538_v26  ;;  %v2558_v26 = vpack.c.bf16 %v461_v18, %v460_v13 }
  0xf9   :  { %2541 = vmatprep.subr.bf16.mxu1 %v2540_v35  ;;  %v462_v35 = vld [vmem:[#allocation5 + $0xb70] sm:$0xff] }
  0xfa   :  { %2511 = vmatpush3.bf16.msra.mxu0 %v2510_v36  ;;  %v2562_v32 = vpack.c.bf16 %v463_v17, %v462_v35 }
  0xfb   :  { %2513 = vmatprep.subr.bf16.mxu0 %v2512_v24 }
  0xfc   :  { %2543 = vmatpush3.bf16.msra.mxu1 %v2542_v37  ;;  %v1706_v37 = vld [vmem:[#allocation7] ss:$0 sm:$0xff] }
  0xfd   :  { %2545 = vmatprep.subr.bf16.mxu1 %v2544_v40 }
  0xfe   :  { %2515 = vmatpush3.bf16.msra.mxu0 %v2514_v23  ;;  %v1596_v23 = vld [vmem:[%s3021_s3 + $0x20] sm:$0xff] }
  0xff   :  { %2517 = vmatprep.subr.bf16.mxu0 %v2516_v47 }
 0x100   :  { %2547 = vmatpush3.bf16.msra.mxu1 %v2546_v46  ;;  %v1597_v46 = vld [vmem:[%s3021_s3 + $0x28] sm:$0xff] }
 0x101   :  { %2549 = vmatprep.subr.bf16.mxu1 %v2548_v51  ;;  %v2571_v47 = vpack.c.bf16 %v1597_v46, %v1596_v23 }
 0x102   :  { %2519 = vmatpush3.bf16.msra.mxu0 %v2518_v57 }
 0x103   :  { %2521 = vmatprep.subr.bf16.mxu0 %v2520_v59 }
 0x104   :  { %2551 = vmatpush3.bf16.msra.mxu1 %v2550_v58  ;;  %v2577_v58 = vpack.c.bf16 %v1601_v56, %v1600_v55 }
 0x105   :  { %2553 = vmatprep.subr.bf16.mxu1 %v2552_v1 }
 0x106   :  { %2523 = vmatpush3.bf16.msra.mxu0 %v2522_v10  ;;  %v1607_v10 = vld [vmem:[%s3021_s3 + $0x78] sm:$0xff] }
 0x107   :  { %2525 = vmatprep.subr.bf16.mxu0 %v2524_v12  ;;  %v2586_v12 = vpack.c.bf16 %v1607_v10, %v1606_v8 }
 0x108   :  { %2555 = vmatpush3.bf16.msra.mxu1 %v2554_v11  ;;  %v2770_v11 = vmov 0.0  }
 0x109   :  { %2557 = vmatprep.subr.bf16.mxu1 %v2556_v16 }
 0x10a   :  { %2527 = vmatpush3.bf16.msra.mxu0 %v2526_v22 }
 0x10b   :  { %2529 = vmatprep.subr.bf16.mxu0 %v2528_v27 }
 0x10c   :  { %2559 = vmatpush3.bf16.msra.mxu1 %v2558_v26 }
 0x10d   :  { %2561 = vmatprep.subr.bf16.mxu1 %v2560_v30 }
 0x10e   :  { %2531 = vmatpush3.bf16.msra.mxu0 %v2530_v31 }
 0x10f   :  { %2564 = vmatprep.subr.bf16.mxu0 %v2768_v5 }
 0x110   :  { %2563 = vmatpush3.bf16.msra.mxu1 %v2562_v32 }
 0x111   :  { %1516 = vmatmul.mubr.f32.vlgmr.msra.gmra.mrb[10].mxu0 %v723_v33 }
 0x112   :  { %2566 = vmatpush3.bf16.msra.mxu0 %v2565_v42  ;;  %2177 = vmatprep.mubr.msk.f32.mxu0 %vm2769_vm0, %v2770_v11 }
 0x113   :  { %1586 = vmatmul.mubr.f32.vlgmr.msra.gmra.mrb[10].mxu1 %v725_v34  ;;  %2567 = vmatprep.subr.bf16.mxu0 %v2768_v5 }
 0x116   :  { %2569 = vmatpush3.bf16.msra.mxu0 %v2568_v44 }
 0x117   :  { %2570 = vmatprep.subr.bf16.mxu0 %v2768_v5 }
 0x11a   :  { %2572 = vmatpush3.bf16.msra.mxu0 %v2571_v47 }
 0x11b   :  { %2573 = vmatprep.subr.bf16.mxu0 %v2768_v5 }
 0x11e   :  { %2575 = vmatpush3.bf16.msra.mxu0 %v2574_v50 }
 0x11f   :  { %2576 = vmatprep.subr.bf16.mxu0 %v2768_v5 }
 0x122   :  { %2578 = vmatpush3.bf16.msra.mxu0 %v2577_v58 }
 0x123   :  { %2579 = vmatprep.subr.bf16.mxu0 %v2768_v5 }
 0x126   :  { %2581 = vmatpush3.bf16.msra.mxu0 %v2580_v2 }
 0x127   :  { %2582 = vmatprep.subr.bf16.mxu0 %v2768_v5 }
 0x12a   :  { %2584 = vmatpush3.bf16.msra.mxu0 %v2583_v7 }
 0x12b   :  { %2585 = vmatprep.subr.bf16.mxu0 %v2768_v5  ;;  %v1707_v5 = vld [vmem:[#allocation8] ss:$0 sm:$0xff] }
 0x12e   :  { %2587 = vmatpush3.bf16.msra.mxu0 %v2586_v12 }
 0x144   :  { %v1740_v36 = vpop.f32.mrb[0].mxu0 }
 0x145   :  { %v1741_v24 = vpop.f32.mrb[1].mxu0 }
 0x146   :  { %v1775_v45 = vpop.f32.mrb[0].mxu1  ;;  %v1742_v38 = vadd.f32 %v1741_v24, %v1740_v36 }
 0x147   :  { %v1776_v39 = vpop.f32.mrb[1].mxu1 }
 0x148   :  { %v1777_v40 = vadd.f32 %v1776_v39, %v1775_v45  ;;  %v818_v41 = vadd.f32 %v1742_v38, %v1706_v37 }
 0x14a   :  { %v888_v9 = vadd.f32 %v1777_v40, %v818_v41 }
 0x164   :  { %v1810_v51 = vpop.f32.mrb[2].mxu0 }
 0x165   :  { %v1811_v53 = vpop.f32.mrb[3].mxu0 }
 0x166   :  { %v1845_v54 = vpop.f32.mrb[2].mxu1  ;;  %v1812_v52 = vadd.f32 %v1811_v53, %v1810_v51 }
 0x167   :  { %v1846_v57 = vpop.f32.mrb[3].mxu1 }
 0x168   :  { %v1847_v59 = vadd.f32 %v1846_v57, %v1845_v54  ;;  %v958_v60 = vadd.f32 %v1812_v52, %v888_v9 }
 0x16a   :  { %v1028_v1 = vadd.f32 %v1847_v59, %v958_v60 }
 0x184   :  { %v1880_v14 = vpop.f32.mrb[4].mxu0 }
 0x185   :  { %v1881_v15 = vpop.f32.mrb[5].mxu0 }
 0x186   :  { %v1915_v13 = vpop.f32.mrb[4].mxu1  ;;  %v1882_v16 = vadd.f32 %v1881_v15, %v1880_v14 }
 0x187   :  { %v1916_v18 = vpop.f32.mrb[5].mxu1 }
 0x188   :  { %v1917_v21 = vadd.f32 %v1916_v18, %v1915_v13  ;;  %v1098_v19 = vadd.f32 %v1882_v16, %v1028_v1 }
 0x18a   :  { %v1168_v25 = vadd.f32 %v1917_v21, %v1098_v19 }
 0x1a4   :  { %v1950_v20 = vpop.f32.mrb[6].mxu0 }
 0x1a5   :  { %v1951_v22 = vpop.f32.mrb[7].mxu0 }
 0x1a6   :  { %v1985_v26 = vpop.f32.mrb[6].mxu1  ;;  %v1952_v27 = vadd.f32 %v1951_v22, %v1950_v20 }
 0x1a7   :  { %v1986_v28 = vpop.f32.mrb[7].mxu1 }
 0x1a8   :  { %v1987_v29 = vadd.f32 %v1986_v28, %v1985_v26  ;;  %v1238_v30 = vadd.f32 %v1952_v27, %v1168_v25 }
 0x1aa   :  { %v1308_v35 = vadd.f32 %v1987_v29, %v1238_v30 }
 0x1c4   :  { %v2020_v17 = vpop.f32.mrb[8].mxu0 }
 0x1c5   :  { %v2021_v31 = vpop.f32.mrb[9].mxu0 }
 0x1c6   :  { %v2055_v32 = vpop.f32.mrb[8].mxu1  ;;  %v2022_v33 = vadd.f32 %v2021_v31, %v2020_v17 }
 0x1c7   :  { %v2056_v34 = vpop.f32.mrb[9].mxu1 }
 0x1c8   :  { %v2057_v36 = vadd.f32 %v2056_v34, %v2055_v32  ;;  %v1378_v37 = vadd.f32 %v2022_v33, %v1308_v35 }
 0x1ca   :  { %v1448_v24 = vadd.f32 %v2057_v36, %v1378_v37 }
 0x1e4   :  { %v2090_v45 = vpop.f32.mrb[10].mxu0 }
 0x1e5   :  { %v2091_v38 = vpop.f32.mrb[11].mxu0 }
 0x1e6   :  { %v2125_v39 = vpop.f32.mrb[10].mxu1  ;;  %v2092_v40 = vadd.f32 %v2091_v38, %v2090_v45 }
 0x1e7   :  { %v2126_v41 = vpop.f32.mrb[11].mxu1 }
 0x1e8   :  { %v2127_v9 = vadd.f32 %v2126_v41, %v2125_v39  ;;  %v1518_v63 = vadd.f32 %v2092_v40, %v1448_v24 }
 0x1ea   :  { %v1588_v0 = vadd.f32 %v2127_v9, %v1518_v63 }
 0x1ec   :  { %2639 = vtanh.f32 %v1588_v0 }
 0x1f6   :  { %v2640_v4 = vpop.eup %2639 }
 0x1f7   :  { %2178 = vmatmul.mubr.f32.vlgmr.msra.gmra.mrb[12].mxu0 %v2640_v4 }
 0x2ca   :  { %v1681_v42 = vpop.f32.mrb[12].mxu0 }
 0x2cb   :  { %v1682_v43 = vadd.f32 %v1707_v5, %v1681_v42  ;;  %v2179_v44 = vpop.f32.mrb[13].mxu0 }
 0x2cd   :  { %1686 = vst.msk [vmem:[#allocation10] sm:$0xff] %vm1685_vm1, %v1682_v43 }
 0x2ce   :  { %1691 = vsyncadd [#allocation4], 96  ;;  %s2771_s3 = smov [#allocation10]  }
 0x2cf   :  { %s1692_s21 = sshll.u32 %s2771_s3, 4  ;;  %s1693_s21 = int_to_ptr.vmem [resolvable:$true] %s1692_s21 }
 0x2d0   :  { %s2729_s22 = scalar_lea.vmem %s1693_s21, 32  ;;  %s2733_s23 = scalar_lea.vmem %s1693_s21, 128 }
 0x2d1   :  { %p2730_p4 = scmp.ne.s32.totalorder %s1693_s21, %s2729_s22  ;;  %p2734_p5 = scmp.lt.s32.totalorder %s1693_s21, %s1693_s21 }
 0x2d2   :  { %p2735_p6 = scmp.lt.s32.totalorder %s2733_s23, %s2729_s22 }
 0x2d4   :  { %p2736_p7 = por %p2735_p6, %p2734_p5 }
 0x2d6   :  { %p2737_p8 = pnand %p2736_p7, %p2730_p4 }
 0x2d8   :  { %2740 = shalt.err (!%p2737_p8)
}
 0x2d9   :  { %s2741_s26 = scalar_lea.hbm %s3023_s5, 32 }
 0x2da   :  { %p2742_p9 = scmp.ne.s32.totalorder %s3023_s5, %s2741_s26  ;;  %p2745_p10 = scmp.lt.u32.totalorder %s2741_s26, %s3023_s5 }
 0x2dc   :  { %p2747_p11 = pnand %p2745_p10, %p2742_p9 }
 0x2de   :  { %2750 = shalt.err (!%p2747_p11)
}
 0x2df   :  { %s2772_s6 = smov 32   ;;  %s2773_s0 = smov 2  }
 0x2e0   :  { %1698 = dma.vmem_to_hbm [thread:$0]  %s1693_s21, 32, %s3023_s5, [#allocation4], %s2772_s6, %s2772_s6, %s2773_s0  }
 0x2e1   :  { %2757 = dma.done.wait [#allocation4], 128  }
 0x2e2   :  { %2758 = vsyncadd [#allocation4], 4294967168 }
 0x2e3   :  { %1702 = vsyncpa [#allocation3], 1 }
 0x2e4   :  { %1703 = vsyncpa [#allocation6], 1 }
 0x2e5   :  { %1704 = vsyncpa [#allocation9], 1 }
 0x2e6   :  { %1705 = vsyncpa [#allocation4], 1 }

</bundles_post_ra>
